<compile_context>
chip_gen: v7x
topology: tpu7x:2x2x1
jax: 0.10.0
libtpu: 0.0.40
codegen_flags: <defaults>
</compile_context>

<pallas_src>
import functools

import jax
import jax.numpy as jnp
from jax.experimental import pallas as pl
from jax.experimental.pallas import tpu as pltpu

KSIZE = 5
PAD = 2
EPS = 1e-5  # nn.InstanceNorm2d default eps


def _shift_reflect(v, d, pos, size, period, hw):
    """Shift `v` by `d` steps along a virtual axis embedded in the lane dim,
    with ReflectionPad2d(pad=2) semantics at the boundaries.

    v:      (C, H*W) lane-dense value.
    d:      static tap offset in {-2..2}.
    pos:    (C, H*W) int32 virtual-axis coordinate of every lane
            (w = lane % W for the column axis, h = lane // W for the row axis).
    size:   virtual-axis extent (W or H).
    period: lane stride of one virtual-axis step (1 for columns, W for rows).
    hw:     H*W (full lane extent).

    out[..., p] = v[..., p'] where p' replaces the virtual coordinate by
    reflect(pos + d)  (-1 -> 1, -2 -> 2, size -> size-2, size+1 -> size-3).
    Bulk shift goes to the XLU (pltpu.roll); the <= 2 boundary rows/cols per
    offset are fixed up with lane-mask selects on the VPU.  Selected positions
    never read a wrapped-around lane, so the circular roll is safe.
    """
    if d == 0:
        return v

    def from_offset(m):  # value taken from virtual coordinate (pos + m)
        if m == 0:
            return v
        return pltpu.roll(v, shift=(-m * period) % hw, axis=1)

    if d == -1:
        return jnp.where(pos == 0, from_offset(1), from_offset(-1))
    if d == 1:
        return jnp.where(pos == size - 1, from_offset(-1), from_offset(1))
    if d == -2:
        return jnp.where(pos == 0, from_offset(2),
                         jnp.where(pos == 1, v, from_offset(-2)))
    if d == 2:
        return jnp.where(pos == size - 1, from_offset(-2),
                         jnp.where(pos == size - 2, v, from_offset(2)))
    raise ValueError(f"unsupported tap offset {d}")


def _conv_in_relu_stage(v, w_ref, chunk_ref, pos_col, pos_row, H, W):
    """Conv2d(5x5, reflection pad 2) + InstanceNorm2d(affine=False) + ReLU.

    v:         (C, H*W) f32 activation (lane-dense).
    w_ref:     (5, C, 5*C) VMEM ref, w_ref[kh][co, kw*C + ci] = w[co, ci, kh, kw].
    chunk_ref: (5*C, H*W) VMEM scratch holding one kernel-row im2col group.
    returns:   (C, H*W) f32.
    """
    C, HW = v.shape

    # Column (kw) reflect-shift variants of the input, shared by all 5 rows.
    col_taps = {dc: _shift_reflect(v, dc, pos_col, W, 1, HW)
                for dc in range(-PAD, PAD + 1)}

    acc = jnp.zeros((C, HW), jnp.float32)
    for kh in range(KSIZE):
        dr = kh - PAD
        # Assemble the K = 5*C im2col group for this kernel row.
        for kw in range(KSIZE):
            tap = _shift_reflect(col_taps[kw - PAD], dr, pos_row, H, W, HW)
            chunk_ref[kw * C:(kw + 1) * C, :] = tap.astype(chunk_ref.dtype)
        # (C, 5C) x (5C, HW) accumulating matmul on the MXU, f32 accumulation.
        acc = acc + jnp.dot(w_ref[kh], chunk_ref[...],
                            preferred_element_type=jnp.float32)

    # InstanceNorm2d (per-channel, biased variance, no affine): two-pass
    # centred statistics (avoids E[x^2]-E[x]^2 cancellation).
    inv_hw = 1.0 / float(HW)
    mean = jnp.sum(acc, axis=1, keepdims=True) * inv_hw
    cent = acc - mean
    var = jnp.sum(cent * cent, axis=1, keepdims=True) * inv_hw
    y = cent * jax.lax.rsqrt(var + EPS)

    return jnp.maximum(y, 0.0)                                   # ReLU


def _residual_block_kernel(x_ref, w1_ref, w2_ref, o_ref, chunk_ref, *, H, W):
    """Fully fused ResidualBlock for one sample (x_ref / o_ref are (C, H*W))."""
    C, HW = x_ref.shape
    x = x_ref[...].astype(jnp.float32)                           # dense load

    # Per-lane (h, w) coordinates, computed once and shared by both stages.
    lane = jax.lax.broadcasted_iota(jnp.int32, (C, HW), 1)
    if W & (W - 1) == 0:                       # power-of-two W: shift/mask
        pos_row = lane >> (W.bit_length() - 1)
        pos_col = lane & (W - 1)
    else:
        pos_row = lane // W
        pos_col = lane % W

    h = _conv_in_relu_stage(x, w1_ref, chunk_ref, pos_col, pos_row, H, W)
    y = _conv_in_relu_stage(h, w2_ref, chunk_ref, pos_col, pos_row, H, W)

    o_ref[...] = (y + x).astype(o_ref.dtype)                     # residual, dense store


def _flatten_weight(w, mxu_dtype):
    """(Co, Ci, 5, 5) -> (5, Co, 5*Ci) with w_g[kh, co, kw*C + ci] = w[co, ci, kh, kw]."""
    C = w.shape[0]
    w_g = jnp.transpose(w, (0, 2, 3, 1)).reshape(C, KSIZE, KSIZE * C)
    return jnp.transpose(w_g, (1, 0, 2)).astype(mxu_dtype)


@functools.partial(jax.jit, static_argnames=("mxu_dtype",))
def residual_block(x, w1, b1, w2, b2, *, mxu_dtype=jnp.float32):
    """Forward pass of ResidualBlock (NCHW, PyTorch layout).

    b1/b2 are accepted for API parity but are mathematical no-ops here:
    InstanceNorm2d(affine=False) removes any per-channel constant added by the
    conv bias.  (If the block ever switches to affine=True or a different norm,
    this shortcut must be removed.)
    """
    del b1, b2
    N, C, H, W = x.shape
    HW = H * W

    w1g = _flatten_weight(w1, mxu_dtype)
    w2g = _flatten_weight(w2, mxu_dtype)

    # Lane-dense activation layout for the kernel (H*W on the lane dim).
    x_flat = x.reshape(N, C, HW)

    kernel = functools.partial(_residual_block_kernel, H=H, W=W)

    out = pl.pallas_call(
        kernel,
        out_shape=jax.ShapeDtypeStruct((N, C, HW), x.dtype),
        grid_spec=pltpu.PrefetchScalarGridSpec(
            num_scalar_prefetch=0,
            grid=(N,),
            in_specs=[
                pl.BlockSpec((None, C, HW), lambda n: (n, 0, 0)),        # one sample
                pl.BlockSpec((KSIZE, C, KSIZE * C), lambda n: (0, 0, 0)),  # w1 groups
                pl.BlockSpec((KSIZE, C, KSIZE * C), lambda n: (0, 0, 0)),  # w2 groups
            ],
            out_specs=pl.BlockSpec((None, C, HW), lambda n: (n, 0, 0)),
            scratch_shapes=[
                pltpu.VMEM((KSIZE * C, HW), mxu_dtype),   # one-row im2col group
            ],
        ),
        compiler_params=pltpu.CompilerParams(
            dimension_semantics=("parallel",)),
    )(x_flat, w1g, w2g)

    return out.reshape(N, C, H, W)


def _init_params(key, channels):
    """Deterministic init mimicking PyTorch Conv2d default (uniform in +-1/sqrt(fan_in))."""
    fan_in = channels * KSIZE * KSIZE
    bound = 1.0 / jnp.sqrt(float(fan_in))
    k1, k2, k3, k4 = jax.random.split(key, 4)
    w1 = jax.random.uniform(k1, (channels, channels, KSIZE, KSIZE), jnp.float32, -bound, bound)
    b1 = jax.random.uniform(k2, (channels,), jnp.float32, -bound, bound)
    w2 = jax.random.uniform(k3, (channels, channels, KSIZE, KSIZE), jnp.float32, -bound, bound)
    b2 = jax.random.uniform(k4, (channels,), jnp.float32, -bound, bound)
    return w1, b1, w2, b2


def _reference(x, w1, b1, w2, b2):
    """Pure-JAX reference (includes the bias, to confirm it cancels under InstanceNorm)."""
    def conv_in_relu(inp, w, b):
        xp = jnp.pad(inp, ((0, 0), (0, 0), (PAD, PAD), (PAD, PAD)), mode="reflect")
        y = jax.lax.conv_general_dilated(
            xp, w, window_strides=(1, 1), padding="VALID",
            dimension_numbers=("NCHW", "OIHW", "NCHW"))
        y = y + b[None, :, None, None]
        mean = y.mean(axis=(2, 3), keepdims=True)
        var = ((y - mean) ** 2).mean(axis=(2, 3), keepdims=True)
        y = (y - mean) / jnp.sqrt(var + EPS)
        return jnp.maximum(y, 0.0)

    h = conv_in_relu(x, w1, b1)
    return conv_in_relu(h, w2, b2) + x


if __name__ == "__main__":
    key = jax.random.PRNGKey(0)
    k_x, k_p = jax.random.split(key)

    N, C, H, W = 2, 4, 16, 16
    x = jax.random.normal(k_x, (N, C, H, W), jnp.float32)
    w1, b1, w2, b2 = _init_params(k_p, C)

    out = jax.block_until_ready(residual_block(x, w1, b1, w2, b2))

    ref = _reference(x, w1, b1, w2, b2)
    assert out.shape == (N, C, H, W)
    err = float(jnp.max(jnp.abs(out - ref)))
    assert err < 1e-4, f"max abs err {err}"

    print("KERNEL_OK")
</pallas_src>

<mosaic_0001>
module attributes {stable_mosaic.version = 11 : i64} {
  func.func @_residual_block_kernel(%arg0: i32, %arg1: memref<1x4x256xf32, #tpu.memory_space<vmem>>, %arg2: memref<5x4x20xf32, #tpu.memory_space<vmem>>, %arg3: memref<5x4x20xf32, #tpu.memory_space<vmem>>, %arg4: memref<1x4x256xf32, #tpu.memory_space<vmem>>, %arg5: memref<20x256xf32, #tpu.memory_space<vmem>>) attributes {dimension_semantics = [#tpu.dimension_semantics<parallel>], iteration_bounds = array<i64: 2>, scalar_prefetch = 0 : i64, scratch_operands = 1 : i64, tpu.core_type = #tpu.core_type<tc>, window_params = [{transform_indices = @transform_0, window_bounds = array<i64: 1, 4, 256>}, {pipeline_mode = #tpu.pipeline_mode<synchronous>, transform_indices = @transform_1, window_bounds = array<i64: 5, 4, 20>}, {pipeline_mode = #tpu.pipeline_mode<synchronous>, transform_indices = @transform_2, window_bounds = array<i64: 5, 4, 20>}, {transform_indices = @transform_3, window_bounds = array<i64: 1, 4, 256>}]} {
    %c0 = arith.constant 0 : index
    %c0_0 = arith.constant 0 : index
    %c0_1 = arith.constant 0 : index
    %0 = vector.load %arg1[%c0, %c0_0, %c0_1] : memref<1x4x256xf32, #tpu.memory_space<vmem>>, vector<1x4x256xf32>
    %1 = vector.shape_cast %0 : vector<1x4x256xf32> to vector<4x256xf32>
    %2 = tpu.iota {dimensions = array<i32: 1>} : vector<4x256xi32>
    %c4_i32 = arith.constant 4 : i32
    %3 = vector.broadcast %c4_i32 : i32 to vector<4x256xi32>
    %4 = arith.shrsi %2, %3 : vector<4x256xi32>
    %c15_i32 = arith.constant 15 : i32
    %5 = vector.broadcast %c15_i32 : i32 to vector<4x256xi32>
    %6 = arith.andi %2, %5 : vector<4x256xi32>
    %c0_i32 = arith.constant 0 : i32
    %7 = vector.broadcast %c0_i32 : i32 to vector<4x256xi32>
    %8 = arith.cmpi eq, %6, %7 : vector<4x256xi32>
    %c254_i32 = arith.constant 254 : i32
    %9 = tpu.dynamic_rotate %1 by %c254_i32 dim 1 : vector<4x256xf32>, i32 -> vector<4x256xf32>
    %c1_i32 = arith.constant 1 : i32
    %10 = vector.broadcast %c1_i32 : i32 to vector<4x256xi32>
    %11 = arith.cmpi eq, %6, %10 : vector<4x256xi32>
    %c2_i32 = arith.constant 2 : i32
    %12 = tpu.dynamic_rotate %1 by %c2_i32 dim 1 : vector<4x256xf32>, i32 -> vector<4x256xf32>
    %13 = arith.select %11, %1, %12 : vector<4x256xi1>, vector<4x256xf32>
    %14 = arith.select %8, %9, %13 : vector<4x256xi1>, vector<4x256xf32>
    %c0_i32_2 = arith.constant 0 : i32
    %15 = vector.broadcast %c0_i32_2 : i32 to vector<4x256xi32>
    %16 = arith.cmpi eq, %6, %15 : vector<4x256xi32>
    %c255_i32 = arith.constant 255 : i32
    %17 = tpu.dynamic_rotate %1 by %c255_i32 dim 1 : vector<4x256xf32>, i32 -> vector<4x256xf32>
    %c1_i32_3 = arith.constant 1 : i32
    %18 = tpu.dynamic_rotate %1 by %c1_i32_3 dim 1 : vector<4x256xf32>, i32 -> vector<4x256xf32>
    %19 = arith.select %16, %17, %18 : vector<4x256xi1>, vector<4x256xf32>
    %c15_i32_4 = arith.constant 15 : i32
    %20 = vector.broadcast %c15_i32_4 : i32 to vector<4x256xi32>
    %21 = arith.cmpi eq, %6, %20 : vector<4x256xi32>
    %c1_i32_5 = arith.constant 1 : i32
    %22 = tpu.dynamic_rotate %1 by %c1_i32_5 dim 1 : vector<4x256xf32>, i32 -> vector<4x256xf32>
    %c255_i32_6 = arith.constant 255 : i32
    %23 = tpu.dynamic_rotate %1 by %c255_i32_6 dim 1 : vector<4x256xf32>, i32 -> vector<4x256xf32>
    %24 = arith.select %21, %22, %23 : vector<4x256xi1>, vector<4x256xf32>
    %c15_i32_7 = arith.constant 15 : i32
    %25 = vector.broadcast %c15_i32_7 : i32 to vector<4x256xi32>
    %26 = arith.cmpi eq, %6, %25 : vector<4x256xi32>
    %c2_i32_8 = arith.constant 2 : i32
    %27 = tpu.dynamic_rotate %1 by %c2_i32_8 dim 1 : vector<4x256xf32>, i32 -> vector<4x256xf32>
    %c14_i32 = arith.constant 14 : i32
    %28 = vector.broadcast %c14_i32 : i32 to vector<4x256xi32>
    %29 = arith.cmpi eq, %6, %28 : vector<4x256xi32>
    %c254_i32_9 = arith.constant 254 : i32
    %30 = tpu.dynamic_rotate %1 by %c254_i32_9 dim 1 : vector<4x256xf32>, i32 -> vector<4x256xf32>
    %31 = arith.select %29, %1, %30 : vector<4x256xi1>, vector<4x256xf32>
    %32 = arith.select %26, %27, %31 : vector<4x256xi1>, vector<4x256xf32>
    %cst = arith.constant 0.000000e+00 : f32
    %33 = vector.broadcast %cst : f32 to vector<4x256xf32>
    %c0_i32_10 = arith.constant 0 : i32
    %34 = vector.broadcast %c0_i32_10 : i32 to vector<4x256xi32>
    %35 = arith.cmpi eq, %4, %34 : vector<4x256xi32>
    %c224_i32 = arith.constant 224 : i32
    %36 = tpu.dynamic_rotate %14 by %c224_i32 dim 1 : vector<4x256xf32>, i32 -> vector<4x256xf32>
    %c1_i32_11 = arith.constant 1 : i32
    %37 = vector.broadcast %c1_i32_11 : i32 to vector<4x256xi32>
    %38 = arith.cmpi eq, %4, %37 : vector<4x256xi32>
    %c32_i32 = arith.constant 32 : i32
    %39 = tpu.dynamic_rotate %14 by %c32_i32 dim 1 : vector<4x256xf32>, i32 -> vector<4x256xf32>
    %40 = arith.select %38, %14, %39 : vector<4x256xi1>, vector<4x256xf32>
    %41 = arith.select %35, %36, %40 : vector<4x256xi1>, vector<4x256xf32>
    %c0_12 = arith.constant 0 : index
    %c0_13 = arith.constant 0 : index
    %42 = vector.load %arg5[%c0_12, %c0_13] : memref<20x256xf32, #tpu.memory_space<vmem>>, vector<4x256xf32>
    tpu.vector_store %arg5[%c0_12, %c0_13], %41 {strides = array<i32>} : memref<20x256xf32, #tpu.memory_space<vmem>>, vector<4x256xf32>,
    %c0_i32_14 = arith.constant 0 : i32
    %43 = vector.broadcast %c0_i32_14 : i32 to vector<4x256xi32>
    %44 = arith.cmpi eq, %4, %43 : vector<4x256xi32>
    %c224_i32_15 = arith.constant 224 : i32
    %45 = tpu.dynamic_rotate %19 by %c224_i32_15 dim 1 : vector<4x256xf32>, i32 -> vector<4x256xf32>
    %c1_i32_16 = arith.constant 1 : i32
    %46 = vector.broadcast %c1_i32_16 : i32 to vector<4x256xi32>
    %47 = arith.cmpi eq, %4, %46 : vector<4x256xi32>
    %c32_i32_17 = arith.constant 32 : i32
    %48 = tpu.dynamic_rotate %19 by %c32_i32_17 dim 1 : vector<4x256xf32>, i32 -> vector<4x256xf32>
    %49 = arith.select %47, %19, %48 : vector<4x256xi1>, vector<4x256xf32>
    %50 = arith.select %44, %45, %49 : vector<4x256xi1>, vector<4x256xf32>
    %c4 = arith.constant 4 : index
    %c0_18 = arith.constant 0 : index
    %51 = vector.load %arg5[%c4, %c0_18] : memref<20x256xf32, #tpu.memory_space<vmem>>, vector<4x256xf32>
    tpu.vector_store %arg5[%c4, %c0_18], %50 {strides = array<i32>} : memref<20x256xf32, #tpu.memory_space<vmem>>, vector<4x256xf32>,
    %c0_i32_19 = arith.constant 0 : i32
    %52 = vector.broadcast %c0_i32_19 : i32 to vector<4x256xi32>
    %53 = arith.cmpi eq, %4, %52 : vector<4x256xi32>
    %c224_i32_20 = arith.constant 224 : i32
    %54 = tpu.dynamic_rotate %1 by %c224_i32_20 dim 1 : vector<4x256xf32>, i32 -> vector<4x256xf32>
    %c1_i32_21 = arith.constant 1 : i32
    %55 = vector.broadcast %c1_i32_21 : i32 to vector<4x256xi32>
    %56 = arith.cmpi eq, %4, %55 : vector<4x256xi32>
    %c32_i32_22 = arith.constant 32 : i32
    %57 = tpu.dynamic_rotate %1 by %c32_i32_22 dim 1 : vector<4x256xf32>, i32 -> vector<4x256xf32>
    %58 = arith.select %56, %1, %57 : vector<4x256xi1>, vector<4x256xf32>
    %59 = arith.select %53, %54, %58 : vector<4x256xi1>, vector<4x256xf32>
    %c8 = arith.constant 8 : index
    %c0_23 = arith.constant 0 : index
    %60 = vector.load %arg5[%c8, %c0_23] : memref<20x256xf32, #tpu.memory_space<vmem>>, vector<4x256xf32>
    tpu.vector_store %arg5[%c8, %c0_23], %59 {strides = array<i32>} : memref<20x256xf32, #tpu.memory_space<vmem>>, vector<4x256xf32>,
    %c0_i32_24 = arith.constant 0 : i32
    %61 = vector.broadcast %c0_i32_24 : i32 to vector<4x256xi32>
    %62 = arith.cmpi eq, %4, %61 : vector<4x256xi32>
    %c224_i32_25 = arith.constant 224 : i32
    %63 = tpu.dynamic_rotate %24 by %c224_i32_25 dim 1 : vector<4x256xf32>, i32 -> vector<4x256xf32>
    %c1_i32_26 = arith.constant 1 : i32
    %64 = vector.broadcast %c1_i32_26 : i32 to vector<4x256xi32>
    %65 = arith.cmpi eq, %4, %64 : vector<4x256xi32>
    %c32_i32_27 = arith.constant 32 : i32
    %66 = tpu.dynamic_rotate %24 by %c32_i32_27 dim 1 : vector<4x256xf32>, i32 -> vector<4x256xf32>
    %67 = arith.select %65, %24, %66 : vector<4x256xi1>, vector<4x256xf32>
    %68 = arith.select %62, %63, %67 : vector<4x256xi1>, vector<4x256xf32>
    %c12 = arith.constant 12 : index
    %c0_28 = arith.constant 0 : index
    %69 = vector.load %arg5[%c12, %c0_28] : memref<20x256xf32, #tpu.memory_space<vmem>>, vector<4x256xf32>
    tpu.vector_store %arg5[%c12, %c0_28], %68 {strides = array<i32>} : memref<20x256xf32, #tpu.memory_space<vmem>>, vector<4x256xf32>,
    %c0_i32_29 = arith.constant 0 : i32
    %70 = vector.broadcast %c0_i32_29 : i32 to vector<4x256xi32>
    %71 = arith.cmpi eq, %4, %70 : vector<4x256xi32>
    %c224_i32_30 = arith.constant 224 : i32
    %72 = tpu.dynamic_rotate %32 by %c224_i32_30 dim 1 : vector<4x256xf32>, i32 -> vector<4x256xf32>
    %c1_i32_31 = arith.constant 1 : i32
    %73 = vector.broadcast %c1_i32_31 : i32 to vector<4x256xi32>
    %74 = arith.cmpi eq, %4, %73 : vector<4x256xi32>
    %c32_i32_32 = arith.constant 32 : i32
    %75 = tpu.dynamic_rotate %32 by %c32_i32_32 dim 1 : vector<4x256xf32>, i32 -> vector<4x256xf32>
    %76 = arith.select %74, %32, %75 : vector<4x256xi1>, vector<4x256xf32>
    %77 = arith.select %71, %72, %76 : vector<4x256xi1>, vector<4x256xf32>
    %c16 = arith.constant 16 : index
    %c0_33 = arith.constant 0 : index
    %78 = vector.load %arg5[%c16, %c0_33] : memref<20x256xf32, #tpu.memory_space<vmem>>, vector<4x256xf32>
    tpu.vector_store %arg5[%c16, %c0_33], %77 {strides = array<i32>} : memref<20x256xf32, #tpu.memory_space<vmem>>, vector<4x256xf32>,
    %c0_34 = arith.constant 0 : index
    %c0_35 = arith.constant 0 : index
    %c0_36 = arith.constant 0 : index
    %79 = vector.load %arg2[%c0_34, %c0_35, %c0_36] : memref<5x4x20xf32, #tpu.memory_space<vmem>>, vector<1x4x20xf32>
    %80 = vector.shape_cast %79 : vector<1x4x20xf32> to vector<4x20xf32>
    %c0_37 = arith.constant 0 : index
    %c0_38 = arith.constant 0 : index
    %81 = vector.load %arg5[%c0_37, %c0_38] : memref<20x256xf32, #tpu.memory_space<vmem>>, vector<20x256xf32>
    %cst_39 = arith.constant dense<0.000000e+00> : vector<4x256xf32>
    %82 = tpu.matmul %80, %81, %cst_39 {dimension_numbers = #tpu.dot_dimension_numbers<[1], [0], [0], [1], [0, 0, 1, 1], [], []>} : vector<4x20xf32>, vector<20x256xf32>, vector<4x256xf32> -> vector<4x256xf32>
    %83 = arith.addf %33, %82 : vector<4x256xf32>
    %c0_i32_40 = arith.constant 0 : i32
    %84 = vector.broadcast %c0_i32_40 : i32 to vector<4x256xi32>
    %85 = arith.cmpi eq, %4, %84 : vector<4x256xi32>
    %c240_i32 = arith.constant 240 : i32
    %86 = tpu.dynamic_rotate %14 by %c240_i32 dim 1 : vector<4x256xf32>, i32 -> vector<4x256xf32>
    %c16_i32 = arith.constant 16 : i32
    %87 = tpu.dynamic_rotate %14 by %c16_i32 dim 1 : vector<4x256xf32>, i32 -> vector<4x256xf32>
    %88 = arith.select %85, %86, %87 : vector<4x256xi1>, vector<4x256xf32>
    %c0_41 = arith.constant 0 : index
    %c0_42 = arith.constant 0 : index
    %89 = vector.load %arg5[%c0_41, %c0_42] : memref<20x256xf32, #tpu.memory_space<vmem>>, vector<4x256xf32>
    tpu.vector_store %arg5[%c0_41, %c0_42], %88 {strides = array<i32>} : memref<20x256xf32, #tpu.memory_space<vmem>>, vector<4x256xf32>,
    %c0_i32_43 = arith.constant 0 : i32
    %90 = vector.broadcast %c0_i32_43 : i32 to vector<4x256xi32>
    %91 = arith.cmpi eq, %4, %90 : vector<4x256xi32>
    %c240_i32_44 = arith.constant 240 : i32
    %92 = tpu.dynamic_rotate %19 by %c240_i32_44 dim 1 : vector<4x256xf32>, i32 -> vector<4x256xf32>
    %c16_i32_45 = arith.constant 16 : i32
    %93 = tpu.dynamic_rotate %19 by %c16_i32_45 dim 1 : vector<4x256xf32>, i32 -> vector<4x256xf32>
    %94 = arith.select %91, %92, %93 : vector<4x256xi1>, vector<4x256xf32>
    %c4_46 = arith.constant 4 : index
    %c0_47 = arith.constant 0 : index
    %95 = vector.load %arg5[%c4_46, %c0_47] : memref<20x256xf32, #tpu.memory_space<vmem>>, vector<4x256xf32>
    tpu.vector_store %arg5[%c4_46, %c0_47], %94 {strides = array<i32>} : memref<20x256xf32, #tpu.memory_space<vmem>>, vector<4x256xf32>,
    %c0_i32_48 = arith.constant 0 : i32
    %96 = vector.broadcast %c0_i32_48 : i32 to vector<4x256xi32>
    %97 = arith.cmpi eq, %4, %96 : vector<4x256xi32>
    %c240_i32_49 = arith.constant 240 : i32
    %98 = tpu.dynamic_rotate %1 by %c240_i32_49 dim 1 : vector<4x256xf32>, i32 -> vector<4x256xf32>
    %c16_i32_50 = arith.constant 16 : i32
    %99 = tpu.dynamic_rotate %1 by %c16_i32_50 dim 1 : vector<4x256xf32>, i32 -> vector<4x256xf32>
    %100 = arith.select %97, %98, %99 : vector<4x256xi1>, vector<4x256xf32>
    %c8_51 = arith.constant 8 : index
    %c0_52 = arith.constant 0 : index
    %101 = vector.load %arg5[%c8_51, %c0_52] : memref<20x256xf32, #tpu.memory_space<vmem>>, vector<4x256xf32>
    tpu.vector_store %arg5[%c8_51, %c0_52], %100 {strides = array<i32>} : memref<20x256xf32, #tpu.memory_space<vmem>>, vector<4x256xf32>,
    %c0_i32_53 = arith.constant 0 : i32
    %102 = vector.broadcast %c0_i32_53 : i32 to vector<4x256xi32>
    %103 = arith.cmpi eq, %4, %102 : vector<4x256xi32>
    %c240_i32_54 = arith.constant 240 : i32
    %104 = tpu.dynamic_rotate %24 by %c240_i32_54 dim 1 : vector<4x256xf32>, i32 -> vector<4x256xf32>
    %c16_i32_55 = arith.constant 16 : i32
    %105 = tpu.dynamic_rotate %24 by %c16_i32_55 dim 1 : vector<4x256xf32>, i32 -> vector<4x256xf32>
    %106 = arith.select %103, %104, %105 : vector<4x256xi1>, vector<4x256xf32>
    %c12_56 = arith.constant 12 : index
    %c0_57 = arith.constant 0 : index
    %107 = vector.load %arg5[%c12_56, %c0_57] : memref<20x256xf32, #tpu.memory_space<vmem>>, vector<4x256xf32>
    tpu.vector_store %arg5[%c12_56, %c0_57], %106 {strides = array<i32>} : memref<20x256xf32, #tpu.memory_space<vmem>>, vector<4x256xf32>,
    %c0_i32_58 = arith.constant 0 : i32
    %108 = vector.broadcast %c0_i32_58 : i32 to vector<4x256xi32>
    %109 = arith.cmpi eq, %4, %108 : vector<4x256xi32>
    %c240_i32_59 = arith.constant 240 : i32
    %110 = tpu.dynamic_rotate %32 by %c240_i32_59 dim 1 : vector<4x256xf32>, i32 -> vector<4x256xf32>
    %c16_i32_60 = arith.constant 16 : i32
    %111 = tpu.dynamic_rotate %32 by %c16_i32_60 dim 1 : vector<4x256xf32>, i32 -> vector<4x256xf32>
    %112 = arith.select %109, %110, %111 : vector<4x256xi1>, vector<4x256xf32>
    %c16_61 = arith.constant 16 : index
    %c0_62 = arith.constant 0 : index
    %113 = vector.load %arg5[%c16_61, %c0_62] : memref<20x256xf32, #tpu.memory_space<vmem>>, vector<4x256xf32>
    tpu.vector_store %arg5[%c16_61, %c0_62], %112 {strides = array<i32>} : memref<20x256xf32, #tpu.memory_space<vmem>>, vector<4x256xf32>,
    %c1 = arith.constant 1 : index
    %c0_63 = arith.constant 0 : index
    %c0_64 = arith.constant 0 : index
    %114 = vector.load %arg2[%c1, %c0_63, %c0_64] : memref<5x4x20xf32, #tpu.memory_space<vmem>>, vector<1x4x20xf32>
    %115 = vector.shape_cast %114 : vector<1x4x20xf32> to vector<4x20xf32>
    %c0_65 = arith.constant 0 : index
    %c0_66 = arith.constant 0 : index
    %116 = vector.load %arg5[%c0_65, %c0_66] : memref<20x256xf32, #tpu.memory_space<vmem>>, vector<20x256xf32>
    %cst_67 = arith.constant dense<0.000000e+00> : vector<4x256xf32>
    %117 = tpu.matmul %115, %116, %cst_67 {dimension_numbers = #tpu.dot_dimension_numbers<[1], [0], [0], [1], [0, 0, 1, 1], [], []>} : vector<4x20xf32>, vector<20x256xf32>, vector<4x256xf32> -> vector<4x256xf32>
    %118 = arith.addf %83, %117 : vector<4x256xf32>
    %c0_68 = arith.constant 0 : index
    %c0_69 = arith.constant 0 : index
    %119 = vector.load %arg5[%c0_68, %c0_69] : memref<20x256xf32, #tpu.memory_space<vmem>>, vector<4x256xf32>
    tpu.vector_store %arg5[%c0_68, %c0_69], %14 {strides = array<i32>} : memref<20x256xf32, #tpu.memory_space<vmem>>, vector<4x256xf32>,
    %c4_70 = arith.constant 4 : index
    %c0_71 = arith.constant 0 : index
    %120 = vector.load %arg5[%c4_70, %c0_71] : memref<20x256xf32, #tpu.memory_space<vmem>>, vector<4x256xf32>
    tpu.vector_store %arg5[%c4_70, %c0_71], %19 {strides = array<i32>} : memref<20x256xf32, #tpu.memory_space<vmem>>, vector<4x256xf32>,
    %c8_72 = arith.constant 8 : index
    %c0_73 = arith.constant 0 : index
    %121 = vector.load %arg5[%c8_72, %c0_73] : memref<20x256xf32, #tpu.memory_space<vmem>>, vector<4x256xf32>
    tpu.vector_store %arg5[%c8_72, %c0_73], %1 {strides = array<i32>} : memref<20x256xf32, #tpu.memory_space<vmem>>, vector<4x256xf32>,
    %c12_74 = arith.constant 12 : index
    %c0_75 = arith.constant 0 : index
    %122 = vector.load %arg5[%c12_74, %c0_75] : memref<20x256xf32, #tpu.memory_space<vmem>>, vector<4x256xf32>
    tpu.vector_store %arg5[%c12_74, %c0_75], %24 {strides = array<i32>} : memref<20x256xf32, #tpu.memory_space<vmem>>, vector<4x256xf32>,
    %c16_76 = arith.constant 16 : index
    %c0_77 = arith.constant 0 : index
    %123 = vector.load %arg5[%c16_76, %c0_77] : memref<20x256xf32, #tpu.memory_space<vmem>>, vector<4x256xf32>
    tpu.vector_store %arg5[%c16_76, %c0_77], %32 {strides = array<i32>} : memref<20x256xf32, #tpu.memory_space<vmem>>, vector<4x256xf32>,
    %c2 = arith.constant 2 : index
    %c0_78 = arith.constant 0 : index
    %c0_79 = arith.constant 0 : index
    %124 = vector.load %arg2[%c2, %c0_78, %c0_79] : memref<5x4x20xf32, #tpu.memory_space<vmem>>, vector<1x4x20xf32>
    %125 = vector.shape_cast %124 : vector<1x4x20xf32> to vector<4x20xf32>
    %c0_80 = arith.constant 0 : index
    %c0_81 = arith.constant 0 : index
    %126 = vector.load %arg5[%c0_80, %c0_81] : memref<20x256xf32, #tpu.memory_space<vmem>>, vector<20x256xf32>
    %cst_82 = arith.constant dense<0.000000e+00> : vector<4x256xf32>
    %127 = tpu.matmul %125, %126, %cst_82 {dimension_numbers = #tpu.dot_dimension_numbers<[1], [0], [0], [1], [0, 0, 1, 1], [], []>} : vector<4x20xf32>, vector<20x256xf32>, vector<4x256xf32> -> vector<4x256xf32>
    %128 = arith.addf %118, %127 : vector<4x256xf32>
    %c15_i32_83 = arith.constant 15 : i32
    %129 = vector.broadcast %c15_i32_83 : i32 to vector<4x256xi32>
    %130 = arith.cmpi eq, %4, %129 : vector<4x256xi32>
    %c16_i32_84 = arith.constant 16 : i32
    %131 = tpu.dynamic_rotate %14 by %c16_i32_84 dim 1 : vector<4x256xf32>, i32 -> vector<4x256xf32>
    %c240_i32_85 = arith.constant 240 : i32
    %132 = tpu.dynamic_rotate %14 by %c240_i32_85 dim 1 : vector<4x256xf32>, i32 -> vector<4x256xf32>
    %133 = arith.select %130, %131, %132 : vector<4x256xi1>, vector<4x256xf32>
    %c0_86 = arith.constant 0 : index
    %c0_87 = arith.constant 0 : index
    %134 = vector.load %arg5[%c0_86, %c0_87] : memref<20x256xf32, #tpu.memory_space<vmem>>, vector<4x256xf32>
    tpu.vector_store %arg5[%c0_86, %c0_87], %133 {strides = array<i32>} : memref<20x256xf32, #tpu.memory_space<vmem>>, vector<4x256xf32>,
    %c15_i32_88 = arith.constant 15 : i32
    %135 = vector.broadcast %c15_i32_88 : i32 to vector<4x256xi32>
    %136 = arith.cmpi eq, %4, %135 : vector<4x256xi32>
    %c16_i32_89 = arith.constant 16 : i32
    %137 = tpu.dynamic_rotate %19 by %c16_i32_89 dim 1 : vector<4x256xf32>, i32 -> vector<4x256xf32>
    %c240_i32_90 = arith.constant 240 : i32
    %138 = tpu.dynamic_rotate %19 by %c240_i32_90 dim 1 : vector<4x256xf32>, i32 -> vector<4x256xf32>
    %139 = arith.select %136, %137, %138 : vector<4x256xi1>, vector<4x256xf32>
    %c4_91 = arith.constant 4 : index
    %c0_92 = arith.constant 0 : index
    %140 = vector.load %arg5[%c4_91, %c0_92] : memref<20x256xf32, #tpu.memory_space<vmem>>, vector<4x256xf32>
    tpu.vector_store %arg5[%c4_91, %c0_92], %139 {strides = array<i32>} : memref<20x256xf32, #tpu.memory_space<vmem>>, vector<4x256xf32>,
    %c15_i32_93 = arith.constant 15 : i32
    %141 = vector.broadcast %c15_i32_93 : i32 to vector<4x256xi32>
    %142 = arith.cmpi eq, %4, %141 : vector<4x256xi32>
    %c16_i32_94 = arith.constant 16 : i32
    %143 = tpu.dynamic_rotate %1 by %c16_i32_94 dim 1 : vector<4x256xf32>, i32 -> vector<4x256xf32>
    %c240_i32_95 = arith.constant 240 : i32
    %144 = tpu.dynamic_rotate %1 by %c240_i32_95 dim 1 : vector<4x256xf32>, i32 -> vector<4x256xf32>
    %145 = arith.select %142, %143, %144 : vector<4x256xi1>, vector<4x256xf32>
    %c8_96 = arith.constant 8 : index
    %c0_97 = arith.constant 0 : index
    %146 = vector.load %arg5[%c8_96, %c0_97] : memref<20x256xf32, #tpu.memory_space<vmem>>, vector<4x256xf32>
    tpu.vector_store %arg5[%c8_96, %c0_97], %145 {strides = array<i32>} : memref<20x256xf32, #tpu.memory_space<vmem>>, vector<4x256xf32>,
    %c15_i32_98 = arith.constant 15 : i32
    %147 = vector.broadcast %c15_i32_98 : i32 to vector<4x256xi32>
    %148 = arith.cmpi eq, %4, %147 : vector<4x256xi32>
    %c16_i32_99 = arith.constant 16 : i32
    %149 = tpu.dynamic_rotate %24 by %c16_i32_99 dim 1 : vector<4x256xf32>, i32 -> vector<4x256xf32>
    %c240_i32_100 = arith.constant 240 : i32
    %150 = tpu.dynamic_rotate %24 by %c240_i32_100 dim 1 : vector<4x256xf32>, i32 -> vector<4x256xf32>
    %151 = arith.select %148, %149, %150 : vector<4x256xi1>, vector<4x256xf32>
    %c12_101 = arith.constant 12 : index
    %c0_102 = arith.constant 0 : index
    %152 = vector.load %arg5[%c12_101, %c0_102] : memref<20x256xf32, #tpu.memory_space<vmem>>, vector<4x256xf32>
    tpu.vector_store %arg5[%c12_101, %c0_102], %151 {strides = array<i32>} : memref<20x256xf32, #tpu.memory_space<vmem>>, vector<4x256xf32>,
    %c15_i32_103 = arith.constant 15 : i32
    %153 = vector.broadcast %c15_i32_103 : i32 to vector<4x256xi32>
    %154 = arith.cmpi eq, %4, %153 : vector<4x256xi32>
    %c16_i32_104 = arith.constant 16 : i32
    %155 = tpu.dynamic_rotate %32 by %c16_i32_104 dim 1 : vector<4x256xf32>, i32 -> vector<4x256xf32>
    %c240_i32_105 = arith.constant 240 : i32
    %156 = tpu.dynamic_rotate %32 by %c240_i32_105 dim 1 : vector<4x256xf32>, i32 -> vector<4x256xf32>
    %157 = arith.select %154, %155, %156 : vector<4x256xi1>, vector<4x256xf32>
    %c16_106 = arith.constant 16 : index
    %c0_107 = arith.constant 0 : index
    %158 = vector.load %arg5[%c16_106, %c0_107] : memref<20x256xf32, #tpu.memory_space<vmem>>, vector<4x256xf32>
    tpu.vector_store %arg5[%c16_106, %c0_107], %157 {strides = array<i32>} : memref<20x256xf32, #tpu.memory_space<vmem>>, vector<4x256xf32>,
    %c3 = arith.constant 3 : index
    %c0_108 = arith.constant 0 : index
    %c0_109 = arith.constant 0 : index
    %159 = vector.load %arg2[%c3, %c0_108, %c0_109] : memref<5x4x20xf32, #tpu.memory_space<vmem>>, vector<1x4x20xf32>
    %160 = vector.shape_cast %159 : vector<1x4x20xf32> to vector<4x20xf32>
    %c0_110 = arith.constant 0 : index
    %c0_111 = arith.constant 0 : index
    %161 = vector.load %arg5[%c0_110, %c0_111] : memref<20x256xf32, #tpu.memory_space<vmem>>, vector<20x256xf32>
    %cst_112 = arith.constant dense<0.000000e+00> : vector<4x256xf32>
    %162 = tpu.matmul %160, %161, %cst_112 {dimension_numbers = #tpu.dot_dimension_numbers<[1], [0], [0], [1], [0, 0, 1, 1], [], []>} : vector<4x20xf32>, vector<20x256xf32>, vector<4x256xf32> -> vector<4x256xf32>
    %163 = arith.addf %128, %162 : vector<4x256xf32>
    %c15_i32_113 = arith.constant 15 : i32
    %164 = vector.broadcast %c15_i32_113 : i32 to vector<4x256xi32>
    %165 = arith.cmpi eq, %4, %164 : vector<4x256xi32>
    %c32_i32_114 = arith.constant 32 : i32
    %166 = tpu.dynamic_rotate %14 by %c32_i32_114 dim 1 : vector<4x256xf32>, i32 -> vector<4x256xf32>
    %c14_i32_115 = arith.constant 14 : i32
    %167 = vector.broadcast %c14_i32_115 : i32 to vector<4x256xi32>
    %168 = arith.cmpi eq, %4, %167 : vector<4x256xi32>
    %c224_i32_116 = arith.constant 224 : i32
    %169 = tpu.dynamic_rotate %14 by %c224_i32_116 dim 1 : vector<4x256xf32>, i32 -> vector<4x256xf32>
    %170 = arith.select %168, %14, %169 : vector<4x256xi1>, vector<4x256xf32>
    %171 = arith.select %165, %166, %170 : vector<4x256xi1>, vector<4x256xf32>
    %c0_117 = arith.constant 0 : index
    %c0_118 = arith.constant 0 : index
    %172 = vector.load %arg5[%c0_117, %c0_118] : memref<20x256xf32, #tpu.memory_space<vmem>>, vector<4x256xf32>
    tpu.vector_store %arg5[%c0_117, %c0_118], %171 {strides = array<i32>} : memref<20x256xf32, #tpu.memory_space<vmem>>, vector<4x256xf32>,
    %c15_i32_119 = arith.constant 15 : i32
    %173 = vector.broadcast %c15_i32_119 : i32 to vector<4x256xi32>
    %174 = arith.cmpi eq, %4, %173 : vector<4x256xi32>
    %c32_i32_120 = arith.constant 32 : i32
    %175 = tpu.dynamic_rotate %19 by %c32_i32_120 dim 1 : vector<4x256xf32>, i32 -> vector<4x256xf32>
    %c14_i32_121 = arith.constant 14 : i32
    %176 = vector.broadcast %c14_i32_121 : i32 to vector<4x256xi32>
    %177 = arith.cmpi eq, %4, %176 : vector<4x256xi32>
    %c224_i32_122 = arith.constant 224 : i32
    %178 = tpu.dynamic_rotate %19 by %c224_i32_122 dim 1 : vector<4x256xf32>, i32 -> vector<4x256xf32>
    %179 = arith.select %177, %19, %178 : vector<4x256xi1>, vector<4x256xf32>
    %180 = arith.select %174, %175, %179 : vector<4x256xi1>, vector<4x256xf32>
    %c4_123 = arith.constant 4 : index
    %c0_124 = arith.constant 0 : index
    %181 = vector.load %arg5[%c4_123, %c0_124] : memref<20x256xf32, #tpu.memory_space<vmem>>, vector<4x256xf32>
    tpu.vector_store %arg5[%c4_123, %c0_124], %180 {strides = array<i32>} : memref<20x256xf32, #tpu.memory_space<vmem>>, vector<4x256xf32>,
    %c15_i32_125 = arith.constant 15 : i32
    %182 = vector.broadcast %c15_i32_125 : i32 to vector<4x256xi32>
    %183 = arith.cmpi eq, %4, %182 : vector<4x256xi32>
    %c32_i32_126 = arith.constant 32 : i32
    %184 = tpu.dynamic_rotate %1 by %c32_i32_126 dim 1 : vector<4x256xf32>, i32 -> vector<4x256xf32>
    %c14_i32_127 = arith.constant 14 : i32
    %185 = vector.broadcast %c14_i32_127 : i32 to vector<4x256xi32>
    %186 = arith.cmpi eq, %4, %185 : vector<4x256xi32>
    %c224_i32_128 = arith.constant 224 : i32
    %187 = tpu.dynamic_rotate %1 by %c224_i32_128 dim 1 : vector<4x256xf32>, i32 -> vector<4x256xf32>
    %188 = arith.select %186, %1, %187 : vector<4x256xi1>, vector<4x256xf32>
    %189 = arith.select %183, %184, %188 : vector<4x256xi1>, vector<4x256xf32>
    %c8_129 = arith.constant 8 : index
    %c0_130 = arith.constant 0 : index
    %190 = vector.load %arg5[%c8_129, %c0_130] : memref<20x256xf32, #tpu.memory_space<vmem>>, vector<4x256xf32>
    tpu.vector_store %arg5[%c8_129, %c0_130], %189 {strides = array<i32>} : memref<20x256xf32, #tpu.memory_space<vmem>>, vector<4x256xf32>,
    %c15_i32_131 = arith.constant 15 : i32
    %191 = vector.broadcast %c15_i32_131 : i32 to vector<4x256xi32>
    %192 = arith.cmpi eq, %4, %191 : vector<4x256xi32>
    %c32_i32_132 = arith.constant 32 : i32
    %193 = tpu.dynamic_rotate %24 by %c32_i32_132 dim 1 : vector<4x256xf32>, i32 -> vector<4x256xf32>
    %c14_i32_133 = arith.constant 14 : i32
    %194 = vector.broadcast %c14_i32_133 : i32 to vector<4x256xi32>
    %195 = arith.cmpi eq, %4, %194 : vector<4x256xi32>
    %c224_i32_134 = arith.constant 224 : i32
    %196 = tpu.dynamic_rotate %24 by %c224_i32_134 dim 1 : vector<4x256xf32>, i32 -> vector<4x256xf32>
    %197 = arith.select %195, %24, %196 : vector<4x256xi1>, vector<4x256xf32>
    %198 = arith.select %192, %193, %197 : vector<4x256xi1>, vector<4x256xf32>
    %c12_135 = arith.constant 12 : index
    %c0_136 = arith.constant 0 : index
    %199 = vector.load %arg5[%c12_135, %c0_136] : memref<20x256xf32, #tpu.memory_space<vmem>>, vector<4x256xf32>
    tpu.vector_store %arg5[%c12_135, %c0_136], %198 {strides = array<i32>} : memref<20x256xf32, #tpu.memory_space<vmem>>, vector<4x256xf32>,
    %c15_i32_137 = arith.constant 15 : i32
    %200 = vector.broadcast %c15_i32_137 : i32 to vector<4x256xi32>
    %201 = arith.cmpi eq, %4, %200 : vector<4x256xi32>
    %c32_i32_138 = arith.constant 32 : i32
    %202 = tpu.dynamic_rotate %32 by %c32_i32_138 dim 1 : vector<4x256xf32>, i32 -> vector<4x256xf32>
    %c14_i32_139 = arith.constant 14 : i32
    %203 = vector.broadcast %c14_i32_139 : i32 to vector<4x256xi32>
    %204 = arith.cmpi eq, %4, %203 : vector<4x256xi32>
    %c224_i32_140 = arith.constant 224 : i32
    %205 = tpu.dynamic_rotate %32 by %c224_i32_140 dim 1 : vector<4x256xf32>, i32 -> vector<4x256xf32>
    %206 = arith.select %204, %32, %205 : vector<4x256xi1>, vector<4x256xf32>
    %207 = arith.select %201, %202, %206 : vector<4x256xi1>, vector<4x256xf32>
    %c16_141 = arith.constant 16 : index
    %c0_142 = arith.constant 0 : index
    %208 = vector.load %arg5[%c16_141, %c0_142] : memref<20x256xf32, #tpu.memory_space<vmem>>, vector<4x256xf32>
    tpu.vector_store %arg5[%c16_141, %c0_142], %207 {strides = array<i32>} : memref<20x256xf32, #tpu.memory_space<vmem>>, vector<4x256xf32>,
    %c4_143 = arith.constant 4 : index
    %c0_144 = arith.constant 0 : index
    %c0_145 = arith.constant 0 : index
    %209 = vector.load %arg2[%c4_143, %c0_144, %c0_145] : memref<5x4x20xf32, #tpu.memory_space<vmem>>, vector<1x4x20xf32>
    %210 = vector.shape_cast %209 : vector<1x4x20xf32> to vector<4x20xf32>
    %c0_146 = arith.constant 0 : index
    %c0_147 = arith.constant 0 : index
    %211 = vector.load %arg5[%c0_146, %c0_147] : memref<20x256xf32, #tpu.memory_space<vmem>>, vector<20x256xf32>
    %cst_148 = arith.constant dense<0.000000e+00> : vector<4x256xf32>
    %212 = tpu.matmul %210, %211, %cst_148 {dimension_numbers = #tpu.dot_dimension_numbers<[1], [0], [0], [1], [0, 0, 1, 1], [], []>} : vector<4x20xf32>, vector<20x256xf32>, vector<4x256xf32> -> vector<4x256xf32>
    %213 = arith.addf %163, %212 : vector<4x256xf32>
    %cst_149 = arith.constant dense<0.000000e+00> : vector<4xf32>
    %214 = vector.multi_reduction <add>, %213, %cst_149 [1] : vector<4x256xf32> to vector<4xf32>
    %215 = vector.shape_cast %214 : vector<4xf32> to vector<4x1xf32>
    %cst_150 = arith.constant 3.906250e-03 : f32
    %216 = vector.broadcast %cst_150 : f32 to vector<4x1xf32>
    %217 = arith.mulf %215, %216 : vector<4x1xf32>
    %218 = vector.broadcast %217 : vector<4x1xf32> to vector<4x256xf32>
    %219 = arith.subf %213, %218 : vector<4x256xf32>
    %220 = arith.mulf %219, %219 : vector<4x256xf32>
    %cst_151 = arith.constant dense<0.000000e+00> : vector<4xf32>
    %221 = vector.multi_reduction <add>, %220, %cst_151 [1] : vector<4x256xf32> to vector<4xf32>
    %222 = vector.shape_cast %221 : vector<4xf32> to vector<4x1xf32>
    %cst_152 = arith.constant 3.906250e-03 : f32
    %223 = vector.broadcast %cst_152 : f32 to vector<4x1xf32>
    %224 = arith.mulf %222, %223 : vector<4x1xf32>
    %cst_153 = arith.constant 9.99999974E-6 : f32
    %225 = vector.broadcast %cst_153 : f32 to vector<4x1xf32>
    %226 = arith.addf %224, %225 : vector<4x1xf32>
    %227 = math.rsqrt %226 : vector<4x1xf32>
    %228 = vector.broadcast %227 : vector<4x1xf32> to vector<4x256xf32>
    %229 = arith.mulf %219, %228 : vector<4x256xf32>
    %cst_154 = arith.constant 0.000000e+00 : f32
    %230 = vector.broadcast %cst_154 : f32 to vector<4x256xf32>
    %231 = arith.maximumf %229, %230 : vector<4x256xf32>
    %c0_i32_155 = arith.constant 0 : i32
    %232 = vector.broadcast %c0_i32_155 : i32 to vector<4x256xi32>
    %233 = arith.cmpi eq, %6, %232 : vector<4x256xi32>
    %c254_i32_156 = arith.constant 254 : i32
    %234 = tpu.dynamic_rotate %231 by %c254_i32_156 dim 1 : vector<4x256xf32>, i32 -> vector<4x256xf32>
    %c1_i32_157 = arith.constant 1 : i32
    %235 = vector.broadcast %c1_i32_157 : i32 to vector<4x256xi32>
    %236 = arith.cmpi eq, %6, %235 : vector<4x256xi32>
    %c2_i32_158 = arith.constant 2 : i32
    %237 = tpu.dynamic_rotate %231 by %c2_i32_158 dim 1 : vector<4x256xf32>, i32 -> vector<4x256xf32>
    %238 = arith.select %236, %231, %237 : vector<4x256xi1>, vector<4x256xf32>
    %239 = arith.select %233, %234, %238 : vector<4x256xi1>, vector<4x256xf32>
    %c0_i32_159 = arith.constant 0 : i32
    %240 = vector.broadcast %c0_i32_159 : i32 to vector<4x256xi32>
    %241 = arith.cmpi eq, %6, %240 : vector<4x256xi32>
    %c255_i32_160 = arith.constant 255 : i32
    %242 = tpu.dynamic_rotate %231 by %c255_i32_160 dim 1 : vector<4x256xf32>, i32 -> vector<4x256xf32>
    %c1_i32_161 = arith.constant 1 : i32
    %243 = tpu.dynamic_rotate %231 by %c1_i32_161 dim 1 : vector<4x256xf32>, i32 -> vector<4x256xf32>
    %244 = arith.select %241, %242, %243 : vector<4x256xi1>, vector<4x256xf32>
    %c15_i32_162 = arith.constant 15 : i32
    %245 = vector.broadcast %c15_i32_162 : i32 to vector<4x256xi32>
    %246 = arith.cmpi eq, %6, %245 : vector<4x256xi32>
    %c1_i32_163 = arith.constant 1 : i32
    %247 = tpu.dynamic_rotate %231 by %c1_i32_163 dim 1 : vector<4x256xf32>, i32 -> vector<4x256xf32>
    %c255_i32_164 = arith.constant 255 : i32
    %248 = tpu.dynamic_rotate %231 by %c255_i32_164 dim 1 : vector<4x256xf32>, i32 -> vector<4x256xf32>
    %249 = arith.select %246, %247, %248 : vector<4x256xi1>, vector<4x256xf32>
    %c15_i32_165 = arith.constant 15 : i32
    %250 = vector.broadcast %c15_i32_165 : i32 to vector<4x256xi32>
    %251 = arith.cmpi eq, %6, %250 : vector<4x256xi32>
    %c2_i32_166 = arith.constant 2 : i32
    %252 = tpu.dynamic_rotate %231 by %c2_i32_166 dim 1 : vector<4x256xf32>, i32 -> vector<4x256xf32>
    %c14_i32_167 = arith.constant 14 : i32
    %253 = vector.broadcast %c14_i32_167 : i32 to vector<4x256xi32>
    %254 = arith.cmpi eq, %6, %253 : vector<4x256xi32>
    %c254_i32_168 = arith.constant 254 : i32
    %255 = tpu.dynamic_rotate %231 by %c254_i32_168 dim 1 : vector<4x256xf32>, i32 -> vector<4x256xf32>
    %256 = arith.select %254, %231, %255 : vector<4x256xi1>, vector<4x256xf32>
    %257 = arith.select %251, %252, %256 : vector<4x256xi1>, vector<4x256xf32>
    %cst_169 = arith.constant 0.000000e+00 : f32
    %258 = vector.broadcast %cst_169 : f32 to vector<4x256xf32>
    %c0_i32_170 = arith.constant 0 : i32
    %259 = vector.broadcast %c0_i32_170 : i32 to vector<4x256xi32>
    %260 = arith.cmpi eq, %4, %259 : vector<4x256xi32>
    %c224_i32_171 = arith.constant 224 : i32
    %261 = tpu.dynamic_rotate %239 by %c224_i32_171 dim 1 : vector<4x256xf32>, i32 -> vector<4x256xf32>
    %c1_i32_172 = arith.constant 1 : i32
    %262 = vector.broadcast %c1_i32_172 : i32 to vector<4x256xi32>
    %263 = arith.cmpi eq, %4, %262 : vector<4x256xi32>
    %c32_i32_173 = arith.constant 32 : i32
    %264 = tpu.dynamic_rotate %239 by %c32_i32_173 dim 1 : vector<4x256xf32>, i32 -> vector<4x256xf32>
    %265 = arith.select %263, %239, %264 : vector<4x256xi1>, vector<4x256xf32>
    %266 = arith.select %260, %261, %265 : vector<4x256xi1>, vector<4x256xf32>
    %c0_174 = arith.constant 0 : index
    %c0_175 = arith.constant 0 : index
    %267 = vector.load %arg5[%c0_174, %c0_175] : memref<20x256xf32, #tpu.memory_space<vmem>>, vector<4x256xf32>
    tpu.vector_store %arg5[%c0_174, %c0_175], %266 {strides = array<i32>} : memref<20x256xf32, #tpu.memory_space<vmem>>, vector<4x256xf32>,
    %c0_i32_176 = arith.constant 0 : i32
    %268 = vector.broadcast %c0_i32_176 : i32 to vector<4x256xi32>
    %269 = arith.cmpi eq, %4, %268 : vector<4x256xi32>
    %c224_i32_177 = arith.constant 224 : i32
    %270 = tpu.dynamic_rotate %244 by %c224_i32_177 dim 1 : vector<4x256xf32>, i32 -> vector<4x256xf32>
    %c1_i32_178 = arith.constant 1 : i32
    %271 = vector.broadcast %c1_i32_178 : i32 to vector<4x256xi32>
    %272 = arith.cmpi eq, %4, %271 : vector<4x256xi32>
    %c32_i32_179 = arith.constant 32 : i32
    %273 = tpu.dynamic_rotate %244 by %c32_i32_179 dim 1 : vector<4x256xf32>, i32 -> vector<4x256xf32>
    %274 = arith.select %272, %244, %273 : vector<4x256xi1>, vector<4x256xf32>
    %275 = arith.select %269, %270, %274 : vector<4x256xi1>, vector<4x256xf32>
    %c4_180 = arith.constant 4 : index
    %c0_181 = arith.constant 0 : index
    %276 = vector.load %arg5[%c4_180, %c0_181] : memref<20x256xf32, #tpu.memory_space<vmem>>, vector<4x256xf32>
    tpu.vector_store %arg5[%c4_180, %c0_181], %275 {strides = array<i32>} : memref<20x256xf32, #tpu.memory_space<vmem>>, vector<4x256xf32>,
    %c0_i32_182 = arith.constant 0 : i32
    %277 = vector.broadcast %c0_i32_182 : i32 to vector<4x256xi32>
    %278 = arith.cmpi eq, %4, %277 : vector<4x256xi32>
    %c224_i32_183 = arith.constant 224 : i32
    %279 = tpu.dynamic_rotate %231 by %c224_i32_183 dim 1 : vector<4x256xf32>, i32 -> vector<4x256xf32>
    %c1_i32_184 = arith.constant 1 : i32
    %280 = vector.broadcast %c1_i32_184 : i32 to vector<4x256xi32>
    %281 = arith.cmpi eq, %4, %280 : vector<4x256xi32>
    %c32_i32_185 = arith.constant 32 : i32
    %282 = tpu.dynamic_rotate %231 by %c32_i32_185 dim 1 : vector<4x256xf32>, i32 -> vector<4x256xf32>
    %283 = arith.select %281, %231, %282 : vector<4x256xi1>, vector<4x256xf32>
    %284 = arith.select %278, %279, %283 : vector<4x256xi1>, vector<4x256xf32>
    %c8_186 = arith.constant 8 : index
    %c0_187 = arith.constant 0 : index
    %285 = vector.load %arg5[%c8_186, %c0_187] : memref<20x256xf32, #tpu.memory_space<vmem>>, vector<4x256xf32>
    tpu.vector_store %arg5[%c8_186, %c0_187], %284 {strides = array<i32>} : memref<20x256xf32, #tpu.memory_space<vmem>>, vector<4x256xf32>,
    %c0_i32_188 = arith.constant 0 : i32
    %286 = vector.broadcast %c0_i32_188 : i32 to vector<4x256xi32>
    %287 = arith.cmpi eq, %4, %286 : vector<4x256xi32>
    %c224_i32_189 = arith.constant 224 : i32
    %288 = tpu.dynamic_rotate %249 by %c224_i32_189 dim 1 : vector<4x256xf32>, i32 -> vector<4x256xf32>
    %c1_i32_190 = arith.constant 1 : i32
    %289 = vector.broadcast %c1_i32_190 : i32 to vector<4x256xi32>
    %290 = arith.cmpi eq, %4, %289 : vector<4x256xi32>
    %c32_i32_191 = arith.constant 32 : i32
    %291 = tpu.dynamic_rotate %249 by %c32_i32_191 dim 1 : vector<4x256xf32>, i32 -> vector<4x256xf32>
    %292 = arith.select %290, %249, %291 : vector<4x256xi1>, vector<4x256xf32>
    %293 = arith.select %287, %288, %292 : vector<4x256xi1>, vector<4x256xf32>
    %c12_192 = arith.constant 12 : index
    %c0_193 = arith.constant 0 : index
    %294 = vector.load %arg5[%c12_192, %c0_193] : memref<20x256xf32, #tpu.memory_space<vmem>>, vector<4x256xf32>
    tpu.vector_store %arg5[%c12_192, %c0_193], %293 {strides = array<i32>} : memref<20x256xf32, #tpu.memory_space<vmem>>, vector<4x256xf32>,
    %c0_i32_194 = arith.constant 0 : i32
    %295 = vector.broadcast %c0_i32_194 : i32 to vector<4x256xi32>
    %296 = arith.cmpi eq, %4, %295 : vector<4x256xi32>
    %c224_i32_195 = arith.constant 224 : i32
    %297 = tpu.dynamic_rotate %257 by %c224_i32_195 dim 1 : vector<4x256xf32>, i32 -> vector<4x256xf32>
    %c1_i32_196 = arith.constant 1 : i32
    %298 = vector.broadcast %c1_i32_196 : i32 to vector<4x256xi32>
    %299 = arith.cmpi eq, %4, %298 : vector<4x256xi32>
    %c32_i32_197 = arith.constant 32 : i32
    %300 = tpu.dynamic_rotate %257 by %c32_i32_197 dim 1 : vector<4x256xf32>, i32 -> vector<4x256xf32>
    %301 = arith.select %299, %257, %300 : vector<4x256xi1>, vector<4x256xf32>
    %302 = arith.select %296, %297, %301 : vector<4x256xi1>, vector<4x256xf32>
    %c16_198 = arith.constant 16 : index
    %c0_199 = arith.constant 0 : index
    %303 = vector.load %arg5[%c16_198, %c0_199] : memref<20x256xf32, #tpu.memory_space<vmem>>, vector<4x256xf32>
    tpu.vector_store %arg5[%c16_198, %c0_199], %302 {strides = array<i32>} : memref<20x256xf32, #tpu.memory_space<vmem>>, vector<4x256xf32>,
    %c0_200 = arith.constant 0 : index
    %c0_201 = arith.constant 0 : index
    %c0_202 = arith.constant 0 : index
    %304 = vector.load %arg3[%c0_200, %c0_201, %c0_202] : memref<5x4x20xf32, #tpu.memory_space<vmem>>, vector<1x4x20xf32>
    %305 = vector.shape_cast %304 : vector<1x4x20xf32> to vector<4x20xf32>
    %c0_203 = arith.constant 0 : index
    %c0_204 = arith.constant 0 : index
    %306 = vector.load %arg5[%c0_203, %c0_204] : memref<20x256xf32, #tpu.memory_space<vmem>>, vector<20x256xf32>
    %cst_205 = arith.constant dense<0.000000e+00> : vector<4x256xf32>
    %307 = tpu.matmul %305, %306, %cst_205 {dimension_numbers = #tpu.dot_dimension_numbers<[1], [0], [0], [1], [0, 0, 1, 1], [], []>} : vector<4x20xf32>, vector<20x256xf32>, vector<4x256xf32> -> vector<4x256xf32>
    %308 = arith.addf %258, %307 : vector<4x256xf32>
    %c0_i32_206 = arith.constant 0 : i32
    %309 = vector.broadcast %c0_i32_206 : i32 to vector<4x256xi32>
    %310 = arith.cmpi eq, %4, %309 : vector<4x256xi32>
    %c240_i32_207 = arith.constant 240 : i32
    %311 = tpu.dynamic_rotate %239 by %c240_i32_207 dim 1 : vector<4x256xf32>, i32 -> vector<4x256xf32>
    %c16_i32_208 = arith.constant 16 : i32
    %312 = tpu.dynamic_rotate %239 by %c16_i32_208 dim 1 : vector<4x256xf32>, i32 -> vector<4x256xf32>
    %313 = arith.select %310, %311, %312 : vector<4x256xi1>, vector<4x256xf32>
    %c0_209 = arith.constant 0 : index
    %c0_210 = arith.constant 0 : index
    %314 = vector.load %arg5[%c0_209, %c0_210] : memref<20x256xf32, #tpu.memory_space<vmem>>, vector<4x256xf32>
    tpu.vector_store %arg5[%c0_209, %c0_210], %313 {strides = array<i32>} : memref<20x256xf32, #tpu.memory_space<vmem>>, vector<4x256xf32>,
    %c0_i32_211 = arith.constant 0 : i32
    %315 = vector.broadcast %c0_i32_211 : i32 to vector<4x256xi32>
    %316 = arith.cmpi eq, %4, %315 : vector<4x256xi32>
    %c240_i32_212 = arith.constant 240 : i32
    %317 = tpu.dynamic_rotate %244 by %c240_i32_212 dim 1 : vector<4x256xf32>, i32 -> vector<4x256xf32>
    %c16_i32_213 = arith.constant 16 : i32
    %318 = tpu.dynamic_rotate %244 by %c16_i32_213 dim 1 : vector<4x256xf32>, i32 -> vector<4x256xf32>
    %319 = arith.select %316, %317, %318 : vector<4x256xi1>, vector<4x256xf32>
    %c4_214 = arith.constant 4 : index
    %c0_215 = arith.constant 0 : index
    %320 = vector.load %arg5[%c4_214, %c0_215] : memref<20x256xf32, #tpu.memory_space<vmem>>, vector<4x256xf32>
    tpu.vector_store %arg5[%c4_214, %c0_215], %319 {strides = array<i32>} : memref<20x256xf32, #tpu.memory_space<vmem>>, vector<4x256xf32>,
    %c0_i32_216 = arith.constant 0 : i32
    %321 = vector.broadcast %c0_i32_216 : i32 to vector<4x256xi32>
    %322 = arith.cmpi eq, %4, %321 : vector<4x256xi32>
    %c240_i32_217 = arith.constant 240 : i32
    %323 = tpu.dynamic_rotate %231 by %c240_i32_217 dim 1 : vector<4x256xf32>, i32 -> vector<4x256xf32>
    %c16_i32_218 = arith.constant 16 : i32
    %324 = tpu.dynamic_rotate %231 by %c16_i32_218 dim 1 : vector<4x256xf32>, i32 -> vector<4x256xf32>
    %325 = arith.select %322, %323, %324 : vector<4x256xi1>, vector<4x256xf32>
    %c8_219 = arith.constant 8 : index
    %c0_220 = arith.constant 0 : index
    %326 = vector.load %arg5[%c8_219, %c0_220] : memref<20x256xf32, #tpu.memory_space<vmem>>, vector<4x256xf32>
    tpu.vector_store %arg5[%c8_219, %c0_220], %325 {strides = array<i32>} : memref<20x256xf32, #tpu.memory_space<vmem>>, vector<4x256xf32>,
    %c0_i32_221 = arith.constant 0 : i32
    %327 = vector.broadcast %c0_i32_221 : i32 to vector<4x256xi32>
    %328 = arith.cmpi eq, %4, %327 : vector<4x256xi32>
    %c240_i32_222 = arith.constant 240 : i32
    %329 = tpu.dynamic_rotate %249 by %c240_i32_222 dim 1 : vector<4x256xf32>, i32 -> vector<4x256xf32>
    %c16_i32_223 = arith.constant 16 : i32
    %330 = tpu.dynamic_rotate %249 by %c16_i32_223 dim 1 : vector<4x256xf32>, i32 -> vector<4x256xf32>
    %331 = arith.select %328, %329, %330 : vector<4x256xi1>, vector<4x256xf32>
    %c12_224 = arith.constant 12 : index
    %c0_225 = arith.constant 0 : index
    %332 = vector.load %arg5[%c12_224, %c0_225] : memref<20x256xf32, #tpu.memory_space<vmem>>, vector<4x256xf32>
    tpu.vector_store %arg5[%c12_224, %c0_225], %331 {strides = array<i32>} : memref<20x256xf32, #tpu.memory_space<vmem>>, vector<4x256xf32>,
    %c0_i32_226 = arith.constant 0 : i32
    %333 = vector.broadcast %c0_i32_226 : i32 to vector<4x256xi32>
    %334 = arith.cmpi eq, %4, %333 : vector<4x256xi32>
    %c240_i32_227 = arith.constant 240 : i32
    %335 = tpu.dynamic_rotate %257 by %c240_i32_227 dim 1 : vector<4x256xf32>, i32 -> vector<4x256xf32>
    %c16_i32_228 = arith.constant 16 : i32
    %336 = tpu.dynamic_rotate %257 by %c16_i32_228 dim 1 : vector<4x256xf32>, i32 -> vector<4x256xf32>
    %337 = arith.select %334, %335, %336 : vector<4x256xi1>, vector<4x256xf32>
    %c16_229 = arith.constant 16 : index
    %c0_230 = arith.constant 0 : index
    %338 = vector.load %arg5[%c16_229, %c0_230] : memref<20x256xf32, #tpu.memory_space<vmem>>, vector<4x256xf32>
    tpu.vector_store %arg5[%c16_229, %c0_230], %337 {strides = array<i32>} : memref<20x256xf32, #tpu.memory_space<vmem>>, vector<4x256xf32>,
    %c1_231 = arith.constant 1 : index
    %c0_232 = arith.constant 0 : index
    %c0_233 = arith.constant 0 : index
    %339 = vector.load %arg3[%c1_231, %c0_232, %c0_233] : memref<5x4x20xf32, #tpu.memory_space<vmem>>, vector<1x4x20xf32>
    %340 = vector.shape_cast %339 : vector<1x4x20xf32> to vector<4x20xf32>
    %c0_234 = arith.constant 0 : index
    %c0_235 = arith.constant 0 : index
    %341 = vector.load %arg5[%c0_234, %c0_235] : memref<20x256xf32, #tpu.memory_space<vmem>>, vector<20x256xf32>
    %cst_236 = arith.constant dense<0.000000e+00> : vector<4x256xf32>
    %342 = tpu.matmul %340, %341, %cst_236 {dimension_numbers = #tpu.dot_dimension_numbers<[1], [0], [0], [1], [0, 0, 1, 1], [], []>} : vector<4x20xf32>, vector<20x256xf32>, vector<4x256xf32> -> vector<4x256xf32>
    %343 = arith.addf %308, %342 : vector<4x256xf32>
    %c0_237 = arith.constant 0 : index
    %c0_238 = arith.constant 0 : index
    %344 = vector.load %arg5[%c0_237, %c0_238] : memref<20x256xf32, #tpu.memory_space<vmem>>, vector<4x256xf32>
    tpu.vector_store %arg5[%c0_237, %c0_238], %239 {strides = array<i32>} : memref<20x256xf32, #tpu.memory_space<vmem>>, vector<4x256xf32>,
    %c4_239 = arith.constant 4 : index
    %c0_240 = arith.constant 0 : index
    %345 = vector.load %arg5[%c4_239, %c0_240] : memref<20x256xf32, #tpu.memory_space<vmem>>, vector<4x256xf32>
    tpu.vector_store %arg5[%c4_239, %c0_240], %244 {strides = array<i32>} : memref<20x256xf32, #tpu.memory_space<vmem>>, vector<4x256xf32>,
    %c8_241 = arith.constant 8 : index
    %c0_242 = arith.constant 0 : index
    %346 = vector.load %arg5[%c8_241, %c0_242] : memref<20x256xf32, #tpu.memory_space<vmem>>, vector<4x256xf32>
    tpu.vector_store %arg5[%c8_241, %c0_242], %231 {strides = array<i32>} : memref<20x256xf32, #tpu.memory_space<vmem>>, vector<4x256xf32>,
    %c12_243 = arith.constant 12 : index
    %c0_244 = arith.constant 0 : index
    %347 = vector.load %arg5[%c12_243, %c0_244] : memref<20x256xf32, #tpu.memory_space<vmem>>, vector<4x256xf32>
    tpu.vector_store %arg5[%c12_243, %c0_244], %249 {strides = array<i32>} : memref<20x256xf32, #tpu.memory_space<vmem>>, vector<4x256xf32>,
    %c16_245 = arith.constant 16 : index
    %c0_246 = arith.constant 0 : index
    %348 = vector.load %arg5[%c16_245, %c0_246] : memref<20x256xf32, #tpu.memory_space<vmem>>, vector<4x256xf32>
    tpu.vector_store %arg5[%c16_245, %c0_246], %257 {strides = array<i32>} : memref<20x256xf32, #tpu.memory_space<vmem>>, vector<4x256xf32>,
    %c2_247 = arith.constant 2 : index
    %c0_248 = arith.constant 0 : index
    %c0_249 = arith.constant 0 : index
    %349 = vector.load %arg3[%c2_247, %c0_248, %c0_249] : memref<5x4x20xf32, #tpu.memory_space<vmem>>, vector<1x4x20xf32>
    %350 = vector.shape_cast %349 : vector<1x4x20xf32> to vector<4x20xf32>
    %c0_250 = arith.constant 0 : index
    %c0_251 = arith.constant 0 : index
    %351 = vector.load %arg5[%c0_250, %c0_251] : memref<20x256xf32, #tpu.memory_space<vmem>>, vector<20x256xf32>
    %cst_252 = arith.constant dense<0.000000e+00> : vector<4x256xf32>
    %352 = tpu.matmul %350, %351, %cst_252 {dimension_numbers = #tpu.dot_dimension_numbers<[1], [0], [0], [1], [0, 0, 1, 1], [], []>} : vector<4x20xf32>, vector<20x256xf32>, vector<4x256xf32> -> vector<4x256xf32>
    %353 = arith.addf %343, %352 : vector<4x256xf32>
    %c15_i32_253 = arith.constant 15 : i32
    %354 = vector.broadcast %c15_i32_253 : i32 to vector<4x256xi32>
    %355 = arith.cmpi eq, %4, %354 : vector<4x256xi32>
    %c16_i32_254 = arith.constant 16 : i32
    %356 = tpu.dynamic_rotate %239 by %c16_i32_254 dim 1 : vector<4x256xf32>, i32 -> vector<4x256xf32>
    %c240_i32_255 = arith.constant 240 : i32
    %357 = tpu.dynamic_rotate %239 by %c240_i32_255 dim 1 : vector<4x256xf32>, i32 -> vector<4x256xf32>
    %358 = arith.select %355, %356, %357 : vector<4x256xi1>, vector<4x256xf32>
    %c0_256 = arith.constant 0 : index
    %c0_257 = arith.constant 0 : index
    %359 = vector.load %arg5[%c0_256, %c0_257] : memref<20x256xf32, #tpu.memory_space<vmem>>, vector<4x256xf32>
    tpu.vector_store %arg5[%c0_256, %c0_257], %358 {strides = array<i32>} : memref<20x256xf32, #tpu.memory_space<vmem>>, vector<4x256xf32>,
    %c15_i32_258 = arith.constant 15 : i32
    %360 = vector.broadcast %c15_i32_258 : i32 to vector<4x256xi32>
    %361 = arith.cmpi eq, %4, %360 : vector<4x256xi32>
    %c16_i32_259 = arith.constant 16 : i32
    %362 = tpu.dynamic_rotate %244 by %c16_i32_259 dim 1 : vector<4x256xf32>, i32 -> vector<4x256xf32>
    %c240_i32_260 = arith.constant 240 : i32
    %363 = tpu.dynamic_rotate %244 by %c240_i32_260 dim 1 : vector<4x256xf32>, i32 -> vector<4x256xf32>
    %364 = arith.select %361, %362, %363 : vector<4x256xi1>, vector<4x256xf32>
    %c4_261 = arith.constant 4 : index
    %c0_262 = arith.constant 0 : index
    %365 = vector.load %arg5[%c4_261, %c0_262] : memref<20x256xf32, #tpu.memory_space<vmem>>, vector<4x256xf32>
    tpu.vector_store %arg5[%c4_261, %c0_262], %364 {strides = array<i32>} : memref<20x256xf32, #tpu.memory_space<vmem>>, vector<4x256xf32>,
    %c15_i32_263 = arith.constant 15 : i32
    %366 = vector.broadcast %c15_i32_263 : i32 to vector<4x256xi32>
    %367 = arith.cmpi eq, %4, %366 : vector<4x256xi32>
    %c16_i32_264 = arith.constant 16 : i32
    %368 = tpu.dynamic_rotate %231 by %c16_i32_264 dim 1 : vector<4x256xf32>, i32 -> vector<4x256xf32>
    %c240_i32_265 = arith.constant 240 : i32
    %369 = tpu.dynamic_rotate %231 by %c240_i32_265 dim 1 : vector<4x256xf32>, i32 -> vector<4x256xf32>
    %370 = arith.select %367, %368, %369 : vector<4x256xi1>, vector<4x256xf32>
    %c8_266 = arith.constant 8 : index
    %c0_267 = arith.constant 0 : index
    %371 = vector.load %arg5[%c8_266, %c0_267] : memref<20x256xf32, #tpu.memory_space<vmem>>, vector<4x256xf32>
    tpu.vector_store %arg5[%c8_266, %c0_267], %370 {strides = array<i32>} : memref<20x256xf32, #tpu.memory_space<vmem>>, vector<4x256xf32>,
    %c15_i32_268 = arith.constant 15 : i32
    %372 = vector.broadcast %c15_i32_268 : i32 to vector<4x256xi32>
    %373 = arith.cmpi eq, %4, %372 : vector<4x256xi32>
    %c16_i32_269 = arith.constant 16 : i32
    %374 = tpu.dynamic_rotate %249 by %c16_i32_269 dim 1 : vector<4x256xf32>, i32 -> vector<4x256xf32>
    %c240_i32_270 = arith.constant 240 : i32
    %375 = tpu.dynamic_rotate %249 by %c240_i32_270 dim 1 : vector<4x256xf32>, i32 -> vector<4x256xf32>
    %376 = arith.select %373, %374, %375 : vector<4x256xi1>, vector<4x256xf32>
    %c12_271 = arith.constant 12 : index
    %c0_272 = arith.constant 0 : index
    %377 = vector.load %arg5[%c12_271, %c0_272] : memref<20x256xf32, #tpu.memory_space<vmem>>, vector<4x256xf32>
    tpu.vector_store %arg5[%c12_271, %c0_272], %376 {strides = array<i32>} : memref<20x256xf32, #tpu.memory_space<vmem>>, vector<4x256xf32>,
    %c15_i32_273 = arith.constant 15 : i32
    %378 = vector.broadcast %c15_i32_273 : i32 to vector<4x256xi32>
    %379 = arith.cmpi eq, %4, %378 : vector<4x256xi32>
    %c16_i32_274 = arith.constant 16 : i32
    %380 = tpu.dynamic_rotate %257 by %c16_i32_274 dim 1 : vector<4x256xf32>, i32 -> vector<4x256xf32>
    %c240_i32_275 = arith.constant 240 : i32
    %381 = tpu.dynamic_rotate %257 by %c240_i32_275 dim 1 : vector<4x256xf32>, i32 -> vector<4x256xf32>
    %382 = arith.select %379, %380, %381 : vector<4x256xi1>, vector<4x256xf32>
    %c16_276 = arith.constant 16 : index
    %c0_277 = arith.constant 0 : index
    %383 = vector.load %arg5[%c16_276, %c0_277] : memref<20x256xf32, #tpu.memory_space<vmem>>, vector<4x256xf32>
    tpu.vector_store %arg5[%c16_276, %c0_277], %382 {strides = array<i32>} : memref<20x256xf32, #tpu.memory_space<vmem>>, vector<4x256xf32>,
    %c3_278 = arith.constant 3 : index
    %c0_279 = arith.constant 0 : index
    %c0_280 = arith.constant 0 : index
    %384 = vector.load %arg3[%c3_278, %c0_279, %c0_280] : memref<5x4x20xf32, #tpu.memory_space<vmem>>, vector<1x4x20xf32>
    %385 = vector.shape_cast %384 : vector<1x4x20xf32> to vector<4x20xf32>
    %c0_281 = arith.constant 0 : index
    %c0_282 = arith.constant 0 : index
    %386 = vector.load %arg5[%c0_281, %c0_282] : memref<20x256xf32, #tpu.memory_space<vmem>>, vector<20x256xf32>
    %cst_283 = arith.constant dense<0.000000e+00> : vector<4x256xf32>
    %387 = tpu.matmul %385, %386, %cst_283 {dimension_numbers = #tpu.dot_dimension_numbers<[1], [0], [0], [1], [0, 0, 1, 1], [], []>} : vector<4x20xf32>, vector<20x256xf32>, vector<4x256xf32> -> vector<4x256xf32>
    %388 = arith.addf %353, %387 : vector<4x256xf32>
    %c15_i32_284 = arith.constant 15 : i32
    %389 = vector.broadcast %c15_i32_284 : i32 to vector<4x256xi32>
    %390 = arith.cmpi eq, %4, %389 : vector<4x256xi32>
    %c32_i32_285 = arith.constant 32 : i32
    %391 = tpu.dynamic_rotate %239 by %c32_i32_285 dim 1 : vector<4x256xf32>, i32 -> vector<4x256xf32>
    %c14_i32_286 = arith.constant 14 : i32
    %392 = vector.broadcast %c14_i32_286 : i32 to vector<4x256xi32>
    %393 = arith.cmpi eq, %4, %392 : vector<4x256xi32>
    %c224_i32_287 = arith.constant 224 : i32
    %394 = tpu.dynamic_rotate %239 by %c224_i32_287 dim 1 : vector<4x256xf32>, i32 -> vector<4x256xf32>
    %395 = arith.select %393, %239, %394 : vector<4x256xi1>, vector<4x256xf32>
    %396 = arith.select %390, %391, %395 : vector<4x256xi1>, vector<4x256xf32>
    %c0_288 = arith.constant 0 : index
    %c0_289 = arith.constant 0 : index
    %397 = vector.load %arg5[%c0_288, %c0_289] : memref<20x256xf32, #tpu.memory_space<vmem>>, vector<4x256xf32>
    tpu.vector_store %arg5[%c0_288, %c0_289], %396 {strides = array<i32>} : memref<20x256xf32, #tpu.memory_space<vmem>>, vector<4x256xf32>,
    %c15_i32_290 = arith.constant 15 : i32
    %398 = vector.broadcast %c15_i32_290 : i32 to vector<4x256xi32>
    %399 = arith.cmpi eq, %4, %398 : vector<4x256xi32>
    %c32_i32_291 = arith.constant 32 : i32
    %400 = tpu.dynamic_rotate %244 by %c32_i32_291 dim 1 : vector<4x256xf32>, i32 -> vector<4x256xf32>
    %c14_i32_292 = arith.constant 14 : i32
    %401 = vector.broadcast %c14_i32_292 : i32 to vector<4x256xi32>
    %402 = arith.cmpi eq, %4, %401 : vector<4x256xi32>
    %c224_i32_293 = arith.constant 224 : i32
    %403 = tpu.dynamic_rotate %244 by %c224_i32_293 dim 1 : vector<4x256xf32>, i32 -> vector<4x256xf32>
    %404 = arith.select %402, %244, %403 : vector<4x256xi1>, vector<4x256xf32>
    %405 = arith.select %399, %400, %404 : vector<4x256xi1>, vector<4x256xf32>
    %c4_294 = arith.constant 4 : index
    %c0_295 = arith.constant 0 : index
    %406 = vector.load %arg5[%c4_294, %c0_295] : memref<20x256xf32, #tpu.memory_space<vmem>>, vector<4x256xf32>
    tpu.vector_store %arg5[%c4_294, %c0_295], %405 {strides = array<i32>} : memref<20x256xf32, #tpu.memory_space<vmem>>, vector<4x256xf32>,
    %c15_i32_296 = arith.constant 15 : i32
    %407 = vector.broadcast %c15_i32_296 : i32 to vector<4x256xi32>
    %408 = arith.cmpi eq, %4, %407 : vector<4x256xi32>
    %c32_i32_297 = arith.constant 32 : i32
    %409 = tpu.dynamic_rotate %231 by %c32_i32_297 dim 1 : vector<4x256xf32>, i32 -> vector<4x256xf32>
    %c14_i32_298 = arith.constant 14 : i32
    %410 = vector.broadcast %c14_i32_298 : i32 to vector<4x256xi32>
    %411 = arith.cmpi eq, %4, %410 : vector<4x256xi32>
    %c224_i32_299 = arith.constant 224 : i32
    %412 = tpu.dynamic_rotate %231 by %c224_i32_299 dim 1 : vector<4x256xf32>, i32 -> vector<4x256xf32>
    %413 = arith.select %411, %231, %412 : vector<4x256xi1>, vector<4x256xf32>
    %414 = arith.select %408, %409, %413 : vector<4x256xi1>, vector<4x256xf32>
    %c8_300 = arith.constant 8 : index
    %c0_301 = arith.constant 0 : index
    %415 = vector.load %arg5[%c8_300, %c0_301] : memref<20x256xf32, #tpu.memory_space<vmem>>, vector<4x256xf32>
    tpu.vector_store %arg5[%c8_300, %c0_301], %414 {strides = array<i32>} : memref<20x256xf32, #tpu.memory_space<vmem>>, vector<4x256xf32>,
    %c15_i32_302 = arith.constant 15 : i32
    %416 = vector.broadcast %c15_i32_302 : i32 to vector<4x256xi32>
    %417 = arith.cmpi eq, %4, %416 : vector<4x256xi32>
    %c32_i32_303 = arith.constant 32 : i32
    %418 = tpu.dynamic_rotate %249 by %c32_i32_303 dim 1 : vector<4x256xf32>, i32 -> vector<4x256xf32>
    %c14_i32_304 = arith.constant 14 : i32
    %419 = vector.broadcast %c14_i32_304 : i32 to vector<4x256xi32>
    %420 = arith.cmpi eq, %4, %419 : vector<4x256xi32>
    %c224_i32_305 = arith.constant 224 : i32
    %421 = tpu.dynamic_rotate %249 by %c224_i32_305 dim 1 : vector<4x256xf32>, i32 -> vector<4x256xf32>
    %422 = arith.select %420, %249, %421 : vector<4x256xi1>, vector<4x256xf32>
    %423 = arith.select %417, %418, %422 : vector<4x256xi1>, vector<4x256xf32>
    %c12_306 = arith.constant 12 : index
    %c0_307 = arith.constant 0 : index
    %424 = vector.load %arg5[%c12_306, %c0_307] : memref<20x256xf32, #tpu.memory_space<vmem>>, vector<4x256xf32>
    tpu.vector_store %arg5[%c12_306, %c0_307], %423 {strides = array<i32>} : memref<20x256xf32, #tpu.memory_space<vmem>>, vector<4x256xf32>,
    %c15_i32_308 = arith.constant 15 : i32
    %425 = vector.broadcast %c15_i32_308 : i32 to vector<4x256xi32>
    %426 = arith.cmpi eq, %4, %425 : vector<4x256xi32>
    %c32_i32_309 = arith.constant 32 : i32
    %427 = tpu.dynamic_rotate %257 by %c32_i32_309 dim 1 : vector<4x256xf32>, i32 -> vector<4x256xf32>
    %c14_i32_310 = arith.constant 14 : i32
    %428 = vector.broadcast %c14_i32_310 : i32 to vector<4x256xi32>
    %429 = arith.cmpi eq, %4, %428 : vector<4x256xi32>
    %c224_i32_311 = arith.constant 224 : i32
    %430 = tpu.dynamic_rotate %257 by %c224_i32_311 dim 1 : vector<4x256xf32>, i32 -> vector<4x256xf32>
    %431 = arith.select %429, %257, %430 : vector<4x256xi1>, vector<4x256xf32>
    %432 = arith.select %426, %427, %431 : vector<4x256xi1>, vector<4x256xf32>
    %c16_312 = arith.constant 16 : index
    %c0_313 = arith.constant 0 : index
    %433 = vector.load %arg5[%c16_312, %c0_313] : memref<20x256xf32, #tpu.memory_space<vmem>>, vector<4x256xf32>
    tpu.vector_store %arg5[%c16_312, %c0_313], %432 {strides = array<i32>} : memref<20x256xf32, #tpu.memory_space<vmem>>, vector<4x256xf32>,
    %c4_314 = arith.constant 4 : index
    %c0_315 = arith.constant 0 : index
    %c0_316 = arith.constant 0 : index
    %434 = vector.load %arg3[%c4_314, %c0_315, %c0_316] : memref<5x4x20xf32, #tpu.memory_space<vmem>>, vector<1x4x20xf32>
    %435 = vector.shape_cast %434 : vector<1x4x20xf32> to vector<4x20xf32>
    %c0_317 = arith.constant 0 : index
    %c0_318 = arith.constant 0 : index
    %436 = vector.load %arg5[%c0_317, %c0_318] : memref<20x256xf32, #tpu.memory_space<vmem>>, vector<20x256xf32>
    %cst_319 = arith.constant dense<0.000000e+00> : vector<4x256xf32>
    %437 = tpu.matmul %435, %436, %cst_319 {dimension_numbers = #tpu.dot_dimension_numbers<[1], [0], [0], [1], [0, 0, 1, 1], [], []>} : vector<4x20xf32>, vector<20x256xf32>, vector<4x256xf32> -> vector<4x256xf32>
    %438 = arith.addf %388, %437 : vector<4x256xf32>
    %cst_320 = arith.constant dense<0.000000e+00> : vector<4xf32>
    %439 = vector.multi_reduction <add>, %438, %cst_320 [1] : vector<4x256xf32> to vector<4xf32>
    %440 = vector.shape_cast %439 : vector<4xf32> to vector<4x1xf32>
    %cst_321 = arith.constant 3.906250e-03 : f32
    %441 = vector.broadcast %cst_321 : f32 to vector<4x1xf32>
    %442 = arith.mulf %440, %441 : vector<4x1xf32>
    %443 = vector.broadcast %442 : vector<4x1xf32> to vector<4x256xf32>
    %444 = arith.subf %438, %443 : vector<4x256xf32>
    %445 = arith.mulf %444, %444 : vector<4x256xf32>
    %cst_322 = arith.constant dense<0.000000e+00> : vector<4xf32>
    %446 = vector.multi_reduction <add>, %445, %cst_322 [1] : vector<4x256xf32> to vector<4xf32>
    %447 = vector.shape_cast %446 : vector<4xf32> to vector<4x1xf32>
    %cst_323 = arith.constant 3.906250e-03 : f32
    %448 = vector.broadcast %cst_323 : f32 to vector<4x1xf32>
    %449 = arith.mulf %447, %448 : vector<4x1xf32>
    %cst_324 = arith.constant 9.99999974E-6 : f32
    %450 = vector.broadcast %cst_324 : f32 to vector<4x1xf32>
    %451 = arith.addf %449, %450 : vector<4x1xf32>
    %452 = math.rsqrt %451 : vector<4x1xf32>
    %453 = vector.broadcast %452 : vector<4x1xf32> to vector<4x256xf32>
    %454 = arith.mulf %444, %453 : vector<4x256xf32>
    %cst_325 = arith.constant 0.000000e+00 : f32
    %455 = vector.broadcast %cst_325 : f32 to vector<4x256xf32>
    %456 = arith.maximumf %454, %455 : vector<4x256xf32>
    %457 = arith.addf %456, %1 : vector<4x256xf32>
    %c0_326 = arith.constant 0 : index
    %c0_327 = arith.constant 0 : index
    %c0_328 = arith.constant 0 : index
    %458 = vector.load %arg4[%c0_326, %c0_327, %c0_328] : memref<1x4x256xf32, #tpu.memory_space<vmem>>, vector<1x4x256xf32>
    %459 = vector.shape_cast %458 : vector<1x4x256xf32> to vector<4x256xf32>
    %460 = vector.shape_cast %457 : vector<4x256xf32> to vector<1x4x256xf32>
    tpu.vector_store %arg4[%c0_326, %c0_327, %c0_328], %460 {strides = array<i32>} : memref<1x4x256xf32, #tpu.memory_space<vmem>>, vector<1x4x256xf32>,
    return
  }
  func.func @transform_0(%arg0: i32) -> (i32, i32, i32) {
    %c0_i32 = arith.constant 0 : i32
    %c0_i32_0 = arith.constant 0 : i32
    %c0_i32_1 = arith.constant 0 : i32
    return %arg0, %c0_i32, %c0_i32_0 : i32, i32, i32
  }
  func.func @transform_1(%arg0: i32) -> (i32, i32, i32) {
    %c0_i32 = arith.constant 0 : i32
    %c0_i32_0 = arith.constant 0 : i32
    %c0_i32_1 = arith.constant 0 : i32
    %c0_i32_2 = arith.constant 0 : i32
    return %c0_i32, %c0_i32_0, %c0_i32_1 : i32, i32, i32
  }
  func.func @transform_2(%arg0: i32) -> (i32, i32, i32) {
    %c0_i32 = arith.constant 0 : i32
    %c0_i32_0 = arith.constant 0 : i32
    %c0_i32_1 = arith.constant 0 : i32
    %c0_i32_2 = arith.constant 0 : i32
    return %c0_i32, %c0_i32_0, %c0_i32_1 : i32, i32, i32
  }
  func.func @transform_3(%arg0: i32) -> (i32, i32, i32) {
    %c0_i32 = arith.constant 0 : i32
    %c0_i32_0 = arith.constant 0 : i32
    %c0_i32_1 = arith.constant 0 : i32
    return %arg0, %c0_i32, %c0_i32_0 : i32, i32, i32
  }
}

</mosaic_0001>

<bundles_post_ra>
// kernel: residual_block.1
= control target key start
LH: loop header
LB: loop body
LE: loop exit
PB: predicated region body
PF: predicated region fallthrough
CT: control target
= control target key end

     0   :  { %s2022_s12 = smov 0   ;;  %s3204_s0 = inlined_call_operand.vmem [shape: f32[2,4,256], index: 0, kind: input, shape index: {}]   ;;  %s3205_s1 = inlined_call_operand.vmem [shape: f32[5,4,20], index: 1, kind: input, shape index: {}]   ;;  %s3206_s2 = inlined_call_operand.vmem [shape: f32[5,4,20], index: 2, kind: input, shape index: {}]   ;;  %s3207_s3 = inlined_call_operand.vmem [shape: f32[2,4,256], index: 3, kind: output, shape index: {}]  }
   0x1 LB: > { %s1856_s13 = sadd.s32 4294967295, %s1991_s12   ;;  %p1860_p0 = scmp.ge.s32.totalorder %s1991_s12, 1  ;;  %s1991_s12 = sphi %s2022_s12, %s13_s12  }
   0x2   : > { %p137_p1 = scmp.lt.s32.totalorder %s1991_s12, 3 }
   0x4   : > { %p138_p2 = pnand %p1860_p0, %p137_p1 }
   0x5   : > { %p161_p3 = scmp.lt.s32.totalorder (!%p138_p2), %s1856_s13, 1  ;;  %s1993_s18 = smov (!%p138_p2), 1   ;;  %v172_v2 = vlaneseq (!%p138_p2)  ;;  %v2001_v53 = vmov (!%p138_p2), 0.0  }
   0x6   : > { %141 = sbr.rel (%p138_p2) target bundleno = 1765 (0x6e5), region = 32  ;;  %s1994_s19 = smov (!%p138_p2), 127   ;;  %522 = vmatprep.mubr.f32.mxu0 (!%p138_p2), %v2001_v53  ;;  %1319 = vmatprep.mubr.f32.mxu1 (!%p138_p2), %v2001_v53 }
   0x7   : > { %s1995_s20 = smov (!%p138_p2), 2   ;;  %s1996_s21 = smov (!%p138_p2), 126   ;;  %v2076_v3 = vand.u32 (!%p138_p2), 127, %v172_v2 }
   0x8   : > { %s1997_s22 = smov (!%p138_p2), 32   ;;  %s1998_s23 = smov (!%p138_p2), 96  }
   0x9   : > { %s1999_s24 = smov (!%p138_p2), 112   ;;  %s2000_s25 = smov (!%p138_p2), 16   ;;  %v174_v4 = vadd.s32 (!%p138_p2), 128, %v2076_v3  ;;  %v2080_v7 = vand.u32 (!%p138_p2), 15, %v2076_v3  ;;  %vm3208_vm0 = vcmp.lt.s32.totalorder (!%p138_p2), %v2076_v3, 1  ;;  %vm3209_vm1 = vcmp.lt.s32.totalorder (!%p138_p2), %v2076_v3, 127 }
   0xa   : > { %v2117_v22 = vshra.s32 (!%p138_p2), %v2076_v3, 4  ;;  %vm245_vm6 = vcmp.lt.s32.totalorder (!%p138_p2), %v2076_v3, 32  ;;  %vm236_vm11 = vcmp.lt.s32.totalorder (!%p138_p2), %v2076_v3, 96 }
   0xb   : > { %v2082_v8 = vand.u32 (!%p138_p2), 15, %v174_v4  ;;  %vm179_vm2 = vcmp.eq.s32.totalorder (!%p138_p2), %v2080_v7, 0  ;;  %vm220_vm4 = vcmp.eq.s32.totalorder (!%p138_p2), %v2080_v7, 15  ;;  %v2114_v19 = vshra.s32 (!%p138_p2), %v174_v4, 4 }
   0xc   : > { %vm239_vm8 = vcmp.eq.s32.totalorder (!%p138_p2), %v2117_v22, 1  ;;  %vm230_vm12 = vcmp.eq.s32.totalorder (!%p138_p2), %v2117_v22, 0  ;;  %vm845_vm13 = vcmp.eq.s32.totalorder (!%p138_p2), %v2117_v22, 14  ;;  %vm3211_vm15 = vcmp.eq.s32.totalorder (!%p138_p2), %v2117_v22, 15 }
   0xd   : > { %s3318_s13 = smov (!%p161_p3, %s1856_s13), 1  ;;  %vm180_vm3 = vcmp.eq.s32.totalorder %v2082_v8, 0  ;;  %vm221_vm5 = vcmp.eq.s32.totalorder %v2082_v8, 15  ;;  %vm240_vm7 = vcmp.eq.s32.totalorder %v2114_v19, 1  ;;  %vm3220_vm9 = vcmp.eq.s32.totalorder %v2114_v19, 0 }
   0xe   : > { %s1905_s14 = sshll.u32 %s3318_s13, 3  ;;  %vm846_vm10 = vcmp.eq.s32.totalorder %v2114_v19, 14  ;;  %vm3210_vm14 = vcmp.eq.s32.totalorder %v2114_v19, 15 }
   0xf   : > { %s165_s17 = scalar_lea.vmem %s3204_s0, %s1905_s14 }
  0x10   : > { %v2038_v0 = vld [vmem:[%s165_s17] sm:$0xff] }
  0x11   : > { %211 = vrot.lane.b32.xlu1 %v2038_v0, %s1993_s18  ;;  %204 = vrot.lane.b32.xlu0 %v2038_v0, %s1994_s19  ;;  %v2046_v1 = vcombine.high %v2038_v0, %v2038_v0 }
  0x15   : > { %193 = vrot.lane.b32.xlu0 %v2038_v0, %s1995_s20  ;;  %213 = vrot.lane.b32.xlu1 %v2046_v1, %s1993_s18 }
  0x19   : > { %195 = vrot.lane.b32.xlu1 %v2046_v1, %s1995_s20  ;;  %206 = vrot.lane.b32.xlu0 %v2046_v1, %s1994_s19 }
  0x1d   : > { %186 = vrot.lane.b32.xlu1 %v2046_v1, %s1996_s21  ;;  %184 = vrot.lane.b32.xlu0 %v2038_v0, %s1996_s21 }
  0x21   : > { %286 = vrot.lane.b32.xlu1 %v2046_v1, %s1997_s22  ;;  %284 = vrot.lane.b32.xlu0 %v2038_v0, %s1997_s22 }
  0x25   : > { %280 = vrot.lane.b32.xlu1 %v2046_v1, %s1998_s23  ;;  %278 = vrot.lane.b32.xlu0 %v2038_v0, %s1998_s23 }
  0x29   : > { %387 = vrot.lane.b32.xlu1 %v2046_v1, %s1999_s24  ;;  %385 = vrot.lane.b32.xlu0 %v2038_v0, %s1999_s24 }
  0x2d   : > { %393 = vrot.lane.b32.xlu1 %v2046_v1, %s2000_s25  ;;  %391 = vrot.lane.b32.xlu0 %v2038_v0, %s2000_s25 }
  0x83   : > { %v212_v5 = vpop.permute.xlu1 %211  ;;  %v205_v6 = vpop.permute.xlu0 %204 }
  0x87   : > { %v2084_v9 = vpop.permute.xlu0 %193  ;;  %v214_v10 = vpop.permute.xlu1 %213 }
  0x88   : > { %v216_v13 = vsel %vm3208_vm0, %v212_v5, %v214_v10  ;;  %v217_v14 = vsel %vm3208_vm0, %v214_v10, %v212_v5  ;;  %vm3217_vm0 = vcmp.lt.s32.totalorder %v2076_v3, 2 }
  0x8b   : > { %v2090_v11 = vpop.permute.xlu1 %195  ;;  %v207_v12 = vpop.permute.xlu0 %206 }
  0x8c   : > { %v209_v15 = vsel %vm3209_vm1, %v205_v6, %v207_v12  ;;  %v210_v16 = vsel %vm3209_vm1, %v207_v12, %v205_v6  ;;  %vm3213_vm1 = vcmp.lt.s32.totalorder %v2076_v3, 126  ;;  %v198_v41 = vsel %vm3217_vm0, %v2084_v9, %v2090_v11 }
  0x8d   : > { %v2102_v17 = vsel %vm179_vm2, %v209_v15, %v217_v14  ;;  %v2106_v18 = vsel %vm180_vm3, %v210_v16, %v216_v13  ;;  %v2121_v23 = vsel %vm220_vm4, %v217_v14, %v209_v15  ;;  %v2125_v24 = vsel %vm221_vm5, %v216_v13, %v210_v16 }
  0x8e   : > { %262 = vrot.lane.b32.xlu1 %v2106_v18, %s1997_s22  ;;  %260 = vrot.lane.b32.xlu0 %v2102_v17, %s1997_s22  ;;  %v199_v42 = vsel %vm3217_vm0, %v2090_v11, %v2084_v9  ;;  %vm3226_vm0 = vcmp.eq.s32.totalorder %v2114_v19, 15 }
  0x8f   : > { %v187_v20 = vpop.permute.xlu1 %186  ;;  %v185_v21 = vpop.permute.xlu0 %184 }
  0x90   : > { %v189_v43 = vsel %vm3213_vm1, %v185_v21, %v187_v20  ;;  %v190_v44 = vsel %vm3213_vm1, %v187_v20, %v185_v21  ;;  %vm3214_vm1 = vcmp.eq.s32.totalorder %v2082_v8, 14 }
  0x91   : > { %v227_v50 = vsel %vm3214_vm1, %v2046_v1, %v190_v44  ;;  %vm3223_vm1 = vcmp.eq.s32.totalorder %v2117_v22, 15 }
  0x92   : > { %304 = vrot.lane.b32.xlu1 %v2125_v24, %s1997_s22  ;;  %302 = vrot.lane.b32.xlu0 %v2121_v23, %s1997_s22  ;;  %v2249_v52 = vsel %vm221_vm5, %v198_v41, %v227_v50 }
  0x93   : > { %v287_v25 = vpop.permute.xlu1 %286  ;;  %v285_v26 = vpop.permute.xlu0 %284 }
  0x94   : > { %v288_v27 = vsel %vm245_vm6, %v285_v26, %v287_v25  ;;  %v289_v28 = vsel %vm245_vm6, %v287_v25, %v285_v26 }
  0x95   : > { %v290_v29 = vsel %vm239_vm8, %v2038_v0, %v289_v28  ;;  %v291_v30 = vsel %vm240_vm7, %v2046_v1, %v288_v27 }
  0x96   : > { %256 = vrot.lane.b32.xlu1 %v2106_v18, %s1998_s23  ;;  %254 = vrot.lane.b32.xlu0 %v2102_v17, %s1998_s23 }
  0x97   : > { %v281_v31 = vpop.permute.xlu1 %280  ;;  %v279_v32 = vpop.permute.xlu0 %278 }
  0x98   : > { %v282_v33 = vsel %vm236_vm11, %v279_v32, %v281_v31  ;;  %v283_v34 = vsel %vm236_vm11, %v281_v31, %v279_v32 }
  0x99   : > { %v292_v35 = vsel %vm230_vm12, %v282_v33, %v290_v29  ;;  %v293_v36 = vsel %vm3220_vm9, %v283_v34, %v291_v30  ;;  %v865_v37 = vsel %vm845_vm13, %v2038_v0, %v282_v33  ;;  %v866_v38 = vsel %vm846_vm10, %v2046_v1, %v283_v34 }
  0x9a   : > { %298 = vrot.lane.b32.xlu1 %v2125_v24, %s1998_s23  ;;  %296 = vrot.lane.b32.xlu0 %v2121_v23, %s1998_s23  ;;  %294 = vst [vmem:[#allocation2 + $0x10] sm:$0xf] %v292_v35  ;;  %295 = vst [vmem:[#allocation2 + $0x18] sm:$0xf] %v293_v36  ;;  %v2175_v39 = vsel %vm3211_vm15, %v289_v28, %v865_v37  ;;  %v2179_v40 = vsel %vm3210_vm14, %v288_v27, %v866_v38  ;;  %vm3212_vm14 = vcmp.eq.s32.totalorder %v2080_v7, 1 }
  0x9b   : > { %vm3216_vm15 = vcmp.eq.s32.totalorder %v2082_v8, 1  ;;  %v200_v45 = vsel %vm3212_vm14, %v2038_v0, %v199_v42  ;;  %vm3215_vm14 = vcmp.eq.s32.totalorder %v2080_v7, 14  ;;  %v388_v54 = vpop.permute.xlu1 %387  ;;  %v386_v55 = vpop.permute.xlu0 %385 }
  0x9c   : > { %v201_v46 = vsel %vm3216_vm15, %v2046_v1, %v198_v41  ;;  %v2221_v47 = vsel %vm179_vm2, %v189_v43, %v200_v45  ;;  %v226_v49 = vsel %vm3215_vm14, %v2038_v0, %v189_v43  ;;  %vm3224_vm14 = vcmp.eq.s32.totalorder %v2114_v19, 15 }
  0x9d   : > { %v2225_v48 = vsel %vm180_vm3, %v190_v44, %v201_v46  ;;  %v2245_v51 = vsel %vm220_vm4, %v199_v42, %v226_v49  ;;  %vm3225_vm15 = vcmp.eq.s32.totalorder %v2117_v22, 15 }
  0x9e   : > { %365 = vrot.lane.b32.xlu1 %v2106_v18, %s1999_s24  ;;  %363 = vrot.lane.b32.xlu0 %v2102_v17, %s1999_s24 }
  0x9f   : > { %v394_v56 = vpop.permute.xlu1 %393  ;;  %v392_v57 = vpop.permute.xlu0 %391 }
  0xa2   : > { %371 = vrot.lane.b32.xlu1 %v2106_v18, %s2000_s25  ;;  %369 = vrot.lane.b32.xlu0 %v2102_v17, %s2000_s25 }
  0xa6   : > { %403 = vrot.lane.b32.xlu1 %v2125_v24, %s1999_s24  ;;  %401 = vrot.lane.b32.xlu0 %v2121_v23, %s1999_s24 }
  0xaa   : > { %409 = vrot.lane.b32.xlu1 %v2125_v24, %s2000_s25  ;;  %407 = vrot.lane.b32.xlu0 %v2121_v23, %s2000_s25 }
  0xae   : > { %243 = vrot.lane.b32.xlu1 %v2225_v48, %s1997_s22  ;;  %241 = vrot.lane.b32.xlu0 %v2221_v47, %s1997_s22 }
  0xb2   : > { %234 = vrot.lane.b32.xlu1 %v2225_v48, %s1998_s23  ;;  %232 = vrot.lane.b32.xlu0 %v2221_v47, %s1998_s23 }
  0xb6   : > { %328 = vrot.lane.b32.xlu1 %v2249_v52, %s1997_s22  ;;  %326 = vrot.lane.b32.xlu0 %v2245_v51, %s1997_s22 }
  0xba   : > { %322 = vrot.lane.b32.xlu1 %v2249_v52, %s1998_s23  ;;  %320 = vrot.lane.b32.xlu0 %v2245_v51, %s1998_s23 }
  0xbe   : > { %347 = vrot.lane.b32.xlu1 %v2225_v48, %s1999_s24  ;;  %345 = vrot.lane.b32.xlu0 %v2221_v47, %s1999_s24 }
  0xc2   : > { %354 = vrot.lane.b32.xlu1 %v2225_v48, %s2000_s25  ;;  %352 = vrot.lane.b32.xlu0 %v2221_v47, %s2000_s25 }
  0xc6   : > { %425 = vrot.lane.b32.xlu1 %v2249_v52, %s1999_s24  ;;  %423 = vrot.lane.b32.xlu0 %v2245_v51, %s1999_s24 }
  0xca   : > { %431 = vrot.lane.b32.xlu1 %v2249_v52, %s2000_s25  ;;  %429 = vrot.lane.b32.xlu0 %v2245_v51, %s2000_s25 }
 0x100   : > { %v263_v58 = vpop.permute.xlu1 %262  ;;  %v261_v59 = vpop.permute.xlu0 %260 }
 0x101   : > { %v264_v62 = vsel %vm245_vm6, %v261_v59, %v263_v58  ;;  %v265_v63 = vsel %vm245_vm6, %v263_v58, %v261_v59 }
 0x102   : > { %v266_v2 = vsel %vm239_vm8, %v2102_v17, %v265_v63  ;;  %v267_v4 = vsel %vm240_vm7, %v2106_v18, %v264_v62 }
 0x104   : > { %v305_v60 = vpop.permute.xlu1 %304  ;;  %v303_v61 = vpop.permute.xlu0 %302 }
 0x105   : > { %v2289_v9 = vsel %vm245_vm6, %v303_v61, %v305_v60  ;;  %v2293_v10 = vsel %vm245_vm6, %v305_v60, %v303_v61 }
 0x106   : > { %v308_v29 = vsel %vm239_vm8, %v2121_v23, %v2293_v10  ;;  %v309_v30 = vsel %vm240_vm7, %v2125_v24, %v2289_v9 }
 0x108   : > { %v257_v5 = vpop.permute.xlu1 %256  ;;  %v255_v6 = vpop.permute.xlu0 %254 }
 0x109   : > { %v258_v11 = vsel %vm236_vm11, %v255_v6, %v257_v5  ;;  %v259_v12 = vsel %vm236_vm11, %v257_v5, %v255_v6 }
 0x10a   : > { %v268_v13 = vsel %vm230_vm12, %v258_v11, %v266_v2  ;;  %v269_v14 = vsel %vm3220_vm9, %v259_v12, %v267_v4  ;;  %v853_v15 = vsel %vm845_vm13, %v2102_v17, %v258_v11  ;;  %v854_v16 = vsel %vm846_vm10, %v2106_v18, %v259_v12 }
 0x10b   : > { %v272_v20 = vrot.slane %v268_v13, 4  ;;  %v273_v21 = vrot.slane %v269_v14, 4  ;;  %v2311_v25 = vsel %vm3223_vm1, %v265_v63, %v853_v15  ;;  %v2315_v26 = vsel %vm3224_vm14, %v264_v62, %v854_v16 }
 0x10c   : > { %v299_v27 = vpop.permute.xlu1 %298  ;;  %v297_v28 = vpop.permute.xlu0 %296  ;;  %vm3218_vm1 = vcmp.lt.s32.totalorder %v2076_v3, 112  ;;  %vm3219_vm14 = vcmp.lt.s32.totalorder %v2076_v3, 16 }
 0x10d   : > { %276 = vst [vmem:[#allocation2] sm:$0xf0] %v272_v20  ;;  %277 = vst [vmem:[#allocation2 + $0x8] sm:$0xf0] %v273_v21  ;;  %v2327_v31 = vsel %vm236_vm11, %v297_v28, %v299_v27  ;;  %v2331_v32 = vsel %vm236_vm11, %v299_v27, %v297_v28  ;;  %v2343_v43 = vsel %vm3218_vm1, %v386_v55, %v388_v54 }
 0x10e   : > { %v310_v33 = vsel %vm230_vm12, %v2327_v31, %v308_v29  ;;  %v311_v34 = vsel %vm3220_vm9, %v2331_v32, %v309_v30  ;;  %v2347_v44 = vsel %vm3218_vm1, %v388_v54, %v386_v55  ;;  %v2351_v45 = vsel %vm3219_vm14, %v392_v57, %v394_v56 }
 0x10f   : > { %v314_v35 = vrot.slane %v310_v33, 4  ;;  %v315_v36 = vrot.slane %v311_v34, 4  ;;  %v2355_v46 = vsel %vm3219_vm14, %v394_v56, %v392_v57  ;;  %v398_v50 = vsel %vm3220_vm9, %v2347_v44, %v2351_v45 }
 0x110   : > { %v366_v37 = vpop.permute.xlu1 %365  ;;  %v364_v38 = vpop.permute.xlu0 %363  ;;  %v397_v49 = vsel %vm230_vm12, %v2343_v43, %v2355_v46 }
 0x111   : > { %318 = vst [vmem:[#allocation2 + $0x10] sm:$0xf0] %v314_v35  ;;  %319 = vst [vmem:[#allocation2 + $0x18] sm:$0xf0] %v315_v36  ;;  %v623_v35 = vrot.slane %v2121_v23, 4  ;;  %v624_v36 = vrot.slane %v2125_v24, 4 }
 0x114   : > { %v372_v41 = vpop.permute.xlu1 %371  ;;  %v370_v42 = vpop.permute.xlu0 %369 }
 0x115   : > { %v2407_v29 = vsel %vm3219_vm14, %v370_v42, %v372_v41  ;;  %v2411_v30 = vsel %vm3219_vm14, %v372_v41, %v370_v42  ;;  %v2427_v41 = vsel %vm3218_vm1, %v366_v37, %v364_v38 }
 0x118   : > { %v2365_v54 = vld [vmem:[#allocation2 + $0x10] sm:$0xff]  ;;  %v2367_v55 = vld [vmem:[#allocation2 + $0x18] sm:$0xff]  ;;  %v404_v58 = vpop.permute.xlu1 %403  ;;  %v402_v59 = vpop.permute.xlu0 %401 }
 0x119   : > { %399 = vst [vmem:[#allocation2 + $0x10] sm:$0xf] %v397_v49  ;;  %400 = vst [vmem:[#allocation2 + $0x18] sm:$0xf] %v398_v50  ;;  %v405_v60 = vsel %vm3218_vm1, %v402_v59, %v404_v58  ;;  %v406_v61 = vsel %vm3218_vm1, %v404_v58, %v402_v59  ;;  %v2423_v49 = vsel %vm3218_vm1, %v364_v38, %v366_v37 }
 0x11c   : > { %v410_v56 = vpop.permute.xlu1 %409  ;;  %v408_v57 = vpop.permute.xlu0 %407 }
 0x11d   : > { %v411_v62 = vsel %vm3219_vm14, %v408_v57, %v410_v56  ;;  %v412_v63 = vsel %vm3219_vm14, %v410_v56, %v408_v57  ;;  %v375_v56 = vsel %vm230_vm12, %v2423_v49, %v2411_v30  ;;  %v376_v57 = vsel %vm3220_vm9, %v2427_v41, %v2407_v29 }
 0x11e   : > { %v413_v2 = vsel %vm230_vm12, %v405_v60, %v412_v63  ;;  %v414_v4 = vsel %vm3220_vm9, %v406_v61, %v411_v62 }
 0x11f   : > { %v417_v5 = vrot.slane %v413_v2, 4  ;;  %v418_v6 = vrot.slane %v414_v4, 4  ;;  %v379_v2 = vrot.slane %v375_v56, 4  ;;  %v380_v4 = vrot.slane %v376_v57, 4 }
 0x120   : > { %v244_v11 = vpop.permute.xlu1 %243  ;;  %v242_v12 = vpop.permute.xlu0 %241 }
 0x121   : > { %421 = vst [vmem:[#allocation2 + $0x10] sm:$0xf0] %v417_v5  ;;  %422 = vst [vmem:[#allocation2 + $0x18] sm:$0xf0] %v418_v6  ;;  %v2383_v13 = vsel %vm245_vm6, %v242_v12, %v244_v11  ;;  %v2387_v14 = vsel %vm245_vm6, %v244_v11, %v242_v12  ;;  %v741_v5 = vsel %vm3225_vm15, %v412_v63, %v405_v60 }
 0x122   : > { %v248_v20 = vsel %vm239_vm8, %v2221_v47, %v2387_v14  ;;  %v249_v21 = vsel %vm240_vm7, %v2225_v48, %v2383_v13  ;;  %v742_v6 = vsel %vm3226_vm0, %v411_v62, %v406_v61  ;;  %vm3227_vm0 = vmmov %vm3225_vm15  ;;  %vm3228_vm15 = vcmp.eq.s32.totalorder %v2114_v19, 15 }
 0x124   : > { %v235_v15 = vpop.permute.xlu1 %234  ;;  %v233_v16 = vpop.permute.xlu0 %232 }
 0x125   : > { %v2399_v27 = vsel %vm236_vm11, %v233_v16, %v235_v15  ;;  %v2403_v28 = vsel %vm236_vm11, %v235_v15, %v233_v16 }
 0x126   : > { %v250_v33 = vsel %vm230_vm12, %v2399_v27, %v248_v20  ;;  %v251_v34 = vsel %vm3220_vm9, %v2403_v28, %v249_v21 }
 0x127   : > { %252 = vst [vmem:[#allocation2] sm:$0xf] %v250_v33  ;;  %253 = vst [vmem:[#allocation2 + $0x8] sm:$0xf] %v251_v34  ;;  %v745_v33 = vrot.slane %v741_v5, 4  ;;  %v746_v34 = vrot.slane %v742_v6, 4 }
 0x128   : > { %v2429_v42 = vld [vmem:[#allocation2 + $0x10] sm:$0xff]  ;;  %v2431_v50 = vld [vmem:[#allocation2 + $0x18] sm:$0xff]  ;;  %v329_v58 = vpop.permute.xlu1 %328  ;;  %v327_v59 = vpop.permute.xlu0 %326 }
 0x129   : > { %619 = vst [vmem:[#allocation2 + $0x10] sm:$0xf] %v2038_v0  ;;  %620 = vst [vmem:[#allocation2 + $0x18] sm:$0xf] %v2046_v1  ;;  %v2445_v37 = vsel %vm245_vm6, %v327_v59, %v329_v58  ;;  %v2449_v38 = vsel %vm245_vm6, %v329_v58, %v327_v59 }
 0x12a   : > { %627 = vst [vmem:[#allocation2 + $0x10] sm:$0xf0] %v623_v35  ;;  %628 = vst [vmem:[#allocation2 + $0x18] sm:$0xf0] %v624_v36  ;;  %v332_v15 = vsel %vm239_vm8, %v2245_v51, %v2449_v38  ;;  %v333_v16 = vsel %vm240_vm7, %v2249_v52, %v2445_v37  ;;  %v737_v35 = vsel %vm3227_vm0, %v2355_v46, %v2343_v43 }
 0x12b   : > { %v738_v36 = vsel %vm3228_vm15, %v2351_v45, %v2347_v44  ;;  %v872_v43 = vsel %vm846_vm10, %v2125_v24, %v2331_v32 }
 0x12c   : > { %v323_v11 = vpop.permute.xlu1 %322  ;;  %v321_v12 = vpop.permute.xlu0 %320  ;;  %v874_v45 = vsel %vm3228_vm15, %v2289_v9, %v872_v43 }
 0x12d   : > { %v2465_v20 = vsel %vm236_vm11, %v321_v12, %v323_v11  ;;  %v2469_v60 = vsel %vm236_vm11, %v323_v11, %v321_v12  ;;  %v878_v6 = vrot.slane %v874_v45, 4 }
 0x12e   : > { %v2471_v61 = vld [vmem:[#allocation2] sm:$0xff]  ;;  %v2473_v62 = vld [vmem:[#allocation2 + $0x8] sm:$0xff]  ;;  %v334_v63 = vsel %vm230_vm12, %v2465_v20, %v332_v15  ;;  %v335_v21 = vsel %vm3220_vm9, %v2469_v60, %v333_v16 }
 0x12f   : > { %383 = vst [vmem:[#allocation2] sm:$0xf0] %v379_v2  ;;  %384 = vst [vmem:[#allocation2 + $0x8] sm:$0xf0] %v380_v4  ;;  %v871_v2 = vsel %vm845_vm13, %v2121_v23, %v2327_v31 }
 0x130   : > { %336 = vst [vmem:[#allocation2 + $0x20] sm:$0xf] %v334_v63  ;;  %337 = vst [vmem:[#allocation2 + $0x28] sm:$0xf] %v335_v21  ;;  %v348_v56 = vpop.permute.xlu1 %347  ;;  %v346_v57 = vpop.permute.xlu0 %345  ;;  %v873_v44 = vsel %vm3227_vm0, %v2293_v10, %v871_v2  ;;  %v613_v63 = vrot.slane %v2102_v17, 4  ;;  %v614_v21 = vrot.slane %v2106_v18, 4 }
 0x131   : > { %v2489_v58 = vld [vmem:[#allocation2 + $0x10] sm:$0xff]  ;;  %v2491_v59 = vld [vmem:[#allocation2 + $0x18] sm:$0xff]  ;;  %v350_v23 = vsel %vm3218_vm1, %v346_v57, %v348_v56  ;;  %v351_v24 = vsel %vm3218_vm1, %v348_v56, %v346_v57  ;;  %v877_v5 = vrot.slane %v873_v44, 4 }
 0x132   : > { %739 = vst [vmem:[#allocation2 + $0x10] sm:$0xf] %v737_v35  ;;  %740 = vst [vmem:[#allocation2 + $0x18] sm:$0xf] %v738_v36 }
 0x133   : > { %749 = vst [vmem:[#allocation2 + $0x10] sm:$0xf0] %v745_v33  ;;  %750 = vst [vmem:[#allocation2 + $0x18] sm:$0xf0] %v746_v34 }
 0x134   : > { %v355_v46 = vpop.permute.xlu1 %354  ;;  %v353_v4 = vpop.permute.xlu0 %352 }
 0x135   : > { %v357_v31 = vsel %vm3219_vm14, %v353_v4, %v355_v46  ;;  %v358_v32 = vsel %vm3219_vm14, %v355_v46, %v353_v4  ;;  %v727_v46 = vsel %vm3227_vm0, %v2411_v30, %v2423_v49  ;;  %v728_v4 = vsel %vm3228_vm15, %v2407_v29, %v2427_v41  ;;  %v1865_v29 = vld [vmem:[%s3205_s1 + $0x4] sm:$0xf] }
 0x136   : > { %v359_v10 = vsel %vm230_vm12, %v350_v23, %v358_v32  ;;  %v360_v9 = vsel %vm3220_vm9, %v351_v24, %v357_v31  ;;  %v1911_v49 = vpack.c.bf16 %v2367_v55, %v2473_v62  ;;  %v1913_v41 = vpack.c.bf16 %v2365_v54, %v2471_v61 }
 0x137   : > { %361 = vst [vmem:[#allocation2] sm:$0xf] %v359_v10  ;;  %362 = vst [vmem:[#allocation2 + $0x8] sm:$0xf] %v360_v9  ;;  %v2533_v56 = vld [vmem:[#allocation2 + $0x20] sm:$0xf] }
 0x138   : > { %v426_v15 = vpop.permute.xlu1 %425  ;;  %v424_v16 = vpop.permute.xlu0 %423  ;;  %v344_v18 = vld [vmem:[#allocation2 + $0x28] sm:$0xf]  ;;  %v731_v10 = vrot.slane %v727_v46, 4  ;;  %v732_v9 = vrot.slane %v728_v4, 4  ;;  %v859_v54 = vrot.slane %v2311_v25, 4  ;;  %v860_v55 = vrot.slane %v2315_v26, 4 }
 0x139   : > { %v427_v35 = vsel %vm3218_vm1, %v424_v16, %v426_v15  ;;  %v2531_v36 = vsel %vm3218_vm1, %v426_v15, %v424_v16  ;;  %vm3222_vm1 = vcmask 1043456  }
 0x13a   : > { %v2519_v11 = vld [vmem:[#allocation2 + $0x10] sm:$0xff]  ;;  %v2521_v12 = vld [vmem:[#allocation2 + $0x18] sm:$0xff] }
 0x13b   : > { %881 = vst [vmem:[#allocation2 + $0x10] sm:$0xf0] %v877_v5  ;;  %882 = vst [vmem:[#allocation2 + $0x18] sm:$0xf0] %v878_v6 }
 0x13c   : > { %869 = vst [vmem:[#allocation2 + $0x10] sm:$0xf] %v2175_v39  ;;  %870 = vst [vmem:[#allocation2 + $0x18] sm:$0xf] %v2179_v40  ;;  %v432_v33 = vpop.permute.xlu1 %431  ;;  %v430_v34 = vpop.permute.xlu0 %429 }
 0x13d   : > { %v433_v39 = vsel %vm3219_vm14, %v430_v34, %v432_v33  ;;  %v434_v40 = vsel %vm3219_vm14, %v432_v33, %v430_v34  ;;  %vm3229_vm14 = vmmov %vm3227_vm0  ;;  %vm3221_vm0 = vcmask 162816   ;;  %v1876_v33 = vld [vmem:[%s3205_s1 + $0xc] sm:$0xf] }
 0x13e   : > { %v441_v17 = vld [vmem:[#allocation2] sm:$0xff]  ;;  %v442_v57 = vld [vmem:[#allocation2 + $0x8] sm:$0xff]  ;;  %v435_v2 = vsel %vm230_vm12, %v427_v35, %v434_v40  ;;  %v436_v43 = vsel %vm3220_vm9, %v2531_v36, %v433_v39  ;;  %vm3230_vm9 = vmmov %vm3228_vm15 }
 0x13f   : > { %609 = vst [vmem:[#allocation2] sm:$0xf] %v2221_v47  ;;  %610 = vst [vmem:[#allocation2 + $0x8] sm:$0xf] %v2225_v48  ;;  %v1907_v44 = vpack.c.bf16 %v2431_v50, %v442_v57  ;;  %v1909_v45 = vpack.c.bf16 %v2429_v42, %v441_v17  ;;  %v723_v42 = vsel %vm3229_vm14, %v358_v32, %v350_v23 }
 0x140   : > { %617 = vst [vmem:[#allocation2] sm:$0xf0] %v613_v63  ;;  %618 = vst [vmem:[#allocation2 + $0x8] sm:$0xf0] %v614_v21  ;;  %v724_v50 = vsel %vm3230_vm9, %v357_v31, %v351_v24  ;;  %v847_v23 = vsel %vm845_vm13, %v2221_v47, %v2399_v27  ;;  %v848_v24 = vsel %vm846_vm10, %v2225_v48, %v2403_v28 }
 0x141   : > { %437 = vst [vmem:[#allocation2 + $0x20] sm:$0xf] %v435_v2  ;;  %438 = vst [vmem:[#allocation2 + $0x28] sm:$0xf] %v436_v43  ;;  %1908 = vmatprep.subr.bf16.mxu0 %v1907_v44  ;;  %v884_v32 = vsel %vm846_vm10, %v2249_v52, %v2469_v60 }
 0x142   : > { %1910 = vmatpush1.bf16.msra.mxu0 %v1909_v45  ;;  %vm3231_vm9 = vmmov %vm3229_vm14 }
 0x143   : > { %v849_v61 = vsel %vm3231_vm9, %v2387_v14, %v847_v23  ;;  %vm3232_vm14 = vmmov %vm3228_vm15  ;;  %v893_v34 = vld [vmem:[#allocation2 + $0x10] sm:$0xff] }
 0x144   : > { %v850_v47 = vsel %vm3232_vm14, %v2383_v13, %v848_v24  ;;  %vm3233_vm15 = vmmov %vm3231_vm9  ;;  %v338_v13 = vld [vmem:[%s3205_s1] sm:$0xf] }
 0x145   : > { %v751_v28 = vsel %vm3233_vm15, %v434_v40, %v427_v35  ;;  %vm3234_vm9 = vmmov %vm3232_vm14 }
 0x146   : > { %v752_v26 = vsel %vm3234_vm9, %v433_v39, %v2531_v36  ;;  %vm3235_vm14 = vmmov %vm3233_vm15 }
 0x147   : > { %v633_v5 = vld [vmem:[#allocation2] sm:$0xff]  ;;  %v634_v6 = vld [vmem:[#allocation2 + $0x8] sm:$0xff]  ;;  %vm3236_vm15 = vmmov %vm3234_vm9  ;;  %vm3237_vm9 = vcmp.lt.s32.totalorder %v2076_v3, 127 }
 0x148   : > { %v445_v15 = vld [vmem:[#allocation2 + $0x20] sm:$0xf]  ;;  %725 = vst [vmem:[#allocation2] sm:$0xf] %v723_v42  ;;  %726 = vst [vmem:[#allocation2 + $0x8] sm:$0xf] %v724_v50  ;;  %v1915_v31 = vpack.c.bf16 %v2491_v59, %v634_v6  ;;  %v1917_v14 = vpack.c.bf16 %v2489_v58, %v633_v5  ;;  %v883_v59 = vsel %vm845_vm13, %v2245_v51, %v2465_v20 }
 0x149   : > { %735 = vst [vmem:[#allocation2] sm:$0xf0] %v731_v10  ;;  %736 = vst [vmem:[#allocation2 + $0x8] sm:$0xf0] %v732_v9  ;;  %v446_v30 = vld [vmem:[#allocation2 + $0x28] sm:$0xf]  ;;  %v885_v58 = vsel %vm3235_vm14, %v2449_v38, %v883_v59 }
 0x14a   : > { %629 = vst [vmem:[#allocation2 + $0x20] sm:$0xf] %v2245_v51  ;;  %630 = vst [vmem:[#allocation2 + $0x28] sm:$0xf] %v2249_v52  ;;  %1866 = vmatprep.subr.msk.mxu0 %vm3222_vm1, %v446_v30  ;;  %v886_v51 = vsel %vm3236_vm15, %v2445_v37, %v884_v32  ;;  %v1872_v20 = vld [vmem:[%s3205_s1 + $0x8] sm:$0xf] }
 0x14b   : > { %1867 = vmatpush1.msk.msra.mxu0 %vm3222_vm1, %v445_v15  ;;  %v894_v37 = vld [vmem:[#allocation2 + $0x18] sm:$0xff]  ;;  %vm3238_vm14 = vmmov %vm3237_vm9  ;;  %vm3239_vm15 = vcmp.lt.s32.totalorder %v2076_v3, 1 }
 0x14c   : > { %1868 = vmatmul.mubr.msk.f32.vlgmr.msra.gmra.mrb[0].mxu0 %vm3221_vm0, %v1865_v29  ;;  %1912 = vmatprep.subr.bf16.mxu0 %v1911_v49 }
 0x14d   : > { %1914 = vmatpush1.bf16.msra.mxu0 %v1913_v41  ;;  %602 = vmatprep.mubr.f32.mxu0 %v2001_v53 }
 0x14e   : > { %1869 = vmatprep.subr.msk.mxu0 %vm3222_vm1, %v344_v18 }
 0x150   : > { %v757_v27 = vld [vmem:[#allocation2] sm:$0xff]  ;;  %v758_v62 = vld [vmem:[#allocation2 + $0x8] sm:$0xff] }
 0x151   : > { %v637_v48 = vld [vmem:[#allocation2 + $0x20] sm:$0xf]  ;;  %851 = vst [vmem:[#allocation2] sm:$0xf] %v849_v61  ;;  %852 = vst [vmem:[#allocation2 + $0x8] sm:$0xf] %v850_v47  ;;  %1870 = vmatpush1.msk.msra.mxu0 %vm3222_vm1, %v2533_v56  ;;  %v1919_v16 = vpack.c.bf16 %v2521_v12, %v758_v62  ;;  %v1921_v60 = vpack.c.bf16 %v2519_v11, %v757_v27 }
 0x152   : > { %863 = vst [vmem:[#allocation2] sm:$0xf0] %v859_v54  ;;  %864 = vst [vmem:[#allocation2 + $0x8] sm:$0xf0] %v860_v55  ;;  %v638_v25 = vld [vmem:[#allocation2 + $0x28] sm:$0xf]  ;;  %1916 = vmatprep.subr.bf16.mxu0 %v1915_v31 }
 0x153   : > { %753 = vst [vmem:[#allocation2 + $0x20] sm:$0xf] %v751_v28  ;;  %754 = vst [vmem:[#allocation2 + $0x28] sm:$0xf] %v752_v26  ;;  %v1880_v56 = vld [vmem:[%s3205_s1 + $0x10] sm:$0xf] }
 0x154   : > { %1871 = vmatmul.mubr.msk.f32.vlgmr.msra.gmra.mrb[0].mxu0 %vm3221_vm0, %v338_v13 }
 0x155   : > { %1918 = vmatpush1.bf16.msra.mxu0 %v1917_v14  ;;  %712 = vmatprep.mubr.f32.mxu0 %v2001_v53 }
 0x156   : > { %1873 = vmatprep.subr.msk.mxu0 %vm3222_vm1, %v638_v25 }
 0x159   : > { %1874 = vmatpush1.msk.msra.mxu0 %vm3222_vm1, %v637_v48  ;;  %v892_v38 = vld [vmem:[#allocation2 + $0x8] sm:$0xff]  ;;  %v891_v21 = vld [vmem:[#allocation2] sm:$0xff] }
 0x15a   : > { %v761_v63 = vld [vmem:[#allocation2 + $0x20] sm:$0xf]  ;;  %v762_v52 = vld [vmem:[#allocation2 + $0x28] sm:$0xf]  ;;  %1920 = vmatprep.subr.bf16.mxu0 %v1919_v16  ;;  %v1923_v12 = vpack.c.bf16 %v894_v37, %v892_v38  ;;  %v1925_v11 = vpack.c.bf16 %v893_v34, %v891_v21 }
 0x15b   : > { %887 = vst [vmem:[#allocation2 + $0x20] sm:$0xf] %v885_v58  ;;  %888 = vst [vmem:[#allocation2 + $0x28] sm:$0xf] %v886_v51 }
 0x15c   : > { %1875 = vmatmul.mubr.msk.f32.vlgmr.msra.gmra.mrb[0].mxu0 %vm3221_vm0, %v1872_v20 }
 0x15d   : > { %1922 = vmatpush1.bf16.msra.mxu0 %v1921_v60  ;;  %836 = vmatprep.mubr.f32.mxu0 %v2001_v53 }
 0x15e   : > { %1877 = vmatprep.subr.msk.mxu0 %vm3222_vm1, %v762_v52 }
 0x161   : > { %1878 = vmatpush1.msk.msra.mxu0 %vm3222_vm1, %v761_v63 }
 0x162   : > { %1924 = vmatprep.subr.bf16.mxu0 %v1923_v12  ;;  %v896_v35 = vld [vmem:[#allocation2 + $0x28] sm:$0xf]  ;;  %v895_v36 = vld [vmem:[#allocation2 + $0x20] sm:$0xf] }
 0x164   : > { %1879 = vmatmul.mubr.msk.f32.vlgmr.msra.gmra.mrb[0].mxu0 %vm3221_vm0, %v1876_v33 }
 0x165   : > { %1926 = vmatpush1.bf16.msra.mxu0 %v1925_v11  ;;  %970 = vmatprep.mubr.f32.mxu0 %v2001_v53 }
 0x166   : > { %1881 = vmatprep.subr.msk.mxu0 %vm3222_vm1, %v896_v35 }
 0x169   : > { %1882 = vmatpush1.msk.msra.mxu0 %vm3222_vm1, %v895_v36 }
 0x16c   : > { %1883 = vmatmul.mubr.msk.f32.vlgmr.msra.gmra.mrb[0].mxu0 %vm3221_vm0, %v1880_v56  ;;  %vm3240_vm0 = vmmov %vm3239_vm15 }
 0x23f   : > { %v972_v39 = vpop.f32.mrb[0].mxu0 }
 0x240   : > { %v979_v40 = vsel %vm3222_vm1, %v972_v39, 0.0  ;;  %v974_v17 = vpop.f32.mrb[1].mxu0 }
 0x241   : > { %v980_v57 = vsel %vm3222_vm1, %v974_v17, 0.0 }
 0x242   : > { %v981_v18 = vadd.f32 %v980_v57, %v979_v40 }
 0x244   : > { %982 = vadd.xlane.f32.xlu0 %v981_v18 }
 0x2d1   : > { %v983_v2 = vpop.xlane.xlu0 %982 }
 0x2d2   : > { %v984_v43 = vmul.f32 0.00390625, %v983_v2 }
 0x2d4   : > { %v985_v44 = vsub.f32 %v972_v39, %v984_v43  ;;  %v986_v45 = vsub.f32 %v974_v17, %v984_v43 }
 0x2d6   : > { %v987_v46 = vmul.f32 %v985_v44, %v985_v44  ;;  %v988_v4 = vmul.f32 %v986_v45, %v986_v45 }
 0x2d8   : > { %v989_v10 = vsel %vm3222_vm1, %v987_v46, 0.0  ;;  %v990_v9 = vsel %vm3222_vm1, %v988_v4, 0.0  ;;  %vm3248_vm1 = vcmp.eq.s32.totalorder %v2080_v7, 1 }
 0x2d9   : > { %v991_v5 = vadd.f32 %v990_v9, %v989_v10 }
 0x2db   : > { %992 = vadd.xlane.f32.xlu1 %v991_v5 }
 0x368   : > { %v993_v6 = vpop.xlane.xlu1 %992 }
 0x369   : > { %v994_v42 = vmul.f32 0.00390625, %v993_v6 }
 0x36b   : > { %v995_v50 = vadd.f32 1e-05, %v994_v42 }
 0x36d   : > { %1981 = vrsqrt.f32 %v995_v50 }
 0x377   : > { %v1982_v15 = vpop.eup %1981 }
 0x378   : > { %v997_v30 = vmul.f32 %v1982_v15, %v985_v44  ;;  %v998_v29 = vmul.f32 %v1982_v15, %v986_v45 }
 0x37a   : > { %v2644_v49 = vmax.f32 %v997_v30, 0.0  ;;  %v2646_v41 = vmax.f32 %v998_v29, 0.0 }
 0x37c   : > { %1019 = vrot.lane.b32.xlu1 %v2646_v41, %s1994_s19  ;;  %1017 = vrot.lane.b32.xlu0 %v2644_v49, %s1994_s19 }
 0x380   : > { %1025 = vrot.lane.b32.xlu1 %v2646_v41, %s1993_s18  ;;  %1023 = vrot.lane.b32.xlu0 %v2644_v49, %s1993_s18 }
 0x384   : > { %1009 = vrot.lane.b32.xlu1 %v2646_v41, %s1995_s20  ;;  %1007 = vrot.lane.b32.xlu0 %v2644_v49, %s1995_s20 }
 0x388   : > { %1003 = vrot.lane.b32.xlu1 %v2646_v41, %s1996_s21  ;;  %1001 = vrot.lane.b32.xlu0 %v2644_v49, %s1996_s21 }
 0x38c   : > { %1087 = vrot.lane.b32.xlu1 %v2646_v41, %s1997_s22  ;;  %1085 = vrot.lane.b32.xlu0 %v2644_v49, %s1997_s22 }
 0x390   : > { %1081 = vrot.lane.b32.xlu1 %v2646_v41, %s1998_s23  ;;  %1079 = vrot.lane.b32.xlu0 %v2644_v49, %s1998_s23 }
 0x394   : > { %1186 = vrot.lane.b32.xlu1 %v2646_v41, %s1999_s24  ;;  %1184 = vrot.lane.b32.xlu0 %v2644_v49, %s1999_s24 }
 0x398   : > { %1192 = vrot.lane.b32.xlu1 %v2646_v41, %s2000_s25  ;;  %1190 = vrot.lane.b32.xlu0 %v2644_v49, %s2000_s25 }
 0x3ee   : > { %v1020_v23 = vpop.permute.xlu1 %1019  ;;  %v1018_v24 = vpop.permute.xlu0 %1017 }
 0x3ef   : > { %v1021_v61 = vsel %vm3237_vm9, %v1018_v24, %v1020_v23  ;;  %v1022_v47 = vsel %vm3238_vm14, %v1020_v23, %v1018_v24  ;;  %vm3242_vm9 = vcmp.eq.s32.totalorder %v2117_v22, 15  ;;  %vm3243_vm14 = vcmp.eq.s32.totalorder %v2114_v19, 15 }
 0x3f2   : > { %v1026_v54 = vpop.permute.xlu1 %1025  ;;  %v1024_v55 = vpop.permute.xlu0 %1023 }
 0x3f3   : > { %v1027_v27 = vsel %vm3239_vm15, %v1024_v55, %v1026_v54  ;;  %v1028_v62 = vsel %vm3240_vm0, %v1026_v54, %v1024_v55  ;;  %vm3241_vm0 = vcmp.eq.s32.totalorder %v2114_v19, 0  ;;  %vm3244_vm15 = vcmp.lt.s32.totalorder %v2076_v3, 2 }
 0x3f4   : > { %v2690_v48 = vsel %vm179_vm2, %v1021_v61, %v1028_v62  ;;  %v2694_v28 = vsel %vm180_vm3, %v1022_v47, %v1027_v27  ;;  %v2702_v26 = vsel %vm220_vm4, %v1028_v62, %v1021_v61  ;;  %v2706_v13 = vsel %vm221_vm5, %v1027_v27, %v1022_v47 }
 0x3f5   : > { %1061 = vrot.lane.b32.xlu0 %v2690_v48, %s1997_s22  ;;  %1063 = vrot.lane.b32.xlu1 %v2694_v28, %s1997_s22 }
 0x3f6   : > { %v1010_v31 = vpop.permute.xlu1 %1009  ;;  %v1008_v25 = vpop.permute.xlu0 %1007 }
 0x3f7   : > { %v1011_v36 = vsel %vm3244_vm15, %v1008_v25, %v1010_v31 }
 0x3f9   : > { %1103 = vrot.lane.b32.xlu0 %v2702_v26, %s1997_s22  ;;  %1105 = vrot.lane.b32.xlu1 %v2706_v13, %s1997_s22 }
 0x3fa   : > { %v1004_v14 = vpop.permute.xlu1 %1003  ;;  %v1002_v59 = vpop.permute.xlu0 %1001 }
 0x3fd   : > { %1055 = vrot.lane.b32.xlu0 %v2690_v48, %s1998_s23  ;;  %1057 = vrot.lane.b32.xlu1 %v2694_v28, %s1998_s23 }
 0x3fe   : > { %v1088_v32 = vpop.permute.xlu1 %1087  ;;  %v1086_v58 = vpop.permute.xlu0 %1085 }
 0x3ff   : > { %v1089_v16 = vsel %vm245_vm6, %v1086_v58, %v1088_v32  ;;  %v1090_v63 = vsel %vm245_vm6, %v1088_v32, %v1086_v58 }
 0x400   : > { %v1091_v52 = vsel %vm239_vm8, %v2644_v49, %v1090_v63  ;;  %v1092_v60 = vsel %vm240_vm7, %v2646_v41, %v1089_v16 }
 0x401   : > { %1097 = vrot.lane.b32.xlu0 %v2702_v26, %s1998_s23  ;;  %1099 = vrot.lane.b32.xlu1 %v2706_v13, %s1998_s23 }
 0x402   : > { %v1082_v51 = vpop.permute.xlu1 %1081  ;;  %v1080_v20 = vpop.permute.xlu0 %1079 }
 0x403   : > { %v1083_v38 = vsel %vm236_vm11, %v1080_v20, %v1082_v51  ;;  %v1084_v37 = vsel %vm236_vm11, %v1082_v51, %v1080_v20 }
 0x404   : > { %v1093_v12 = vsel %vm230_vm12, %v1083_v38, %v1091_v52  ;;  %v1094_v21 = vsel %vm3241_vm0, %v1084_v37, %v1092_v60  ;;  %v1658_v33 = vsel %vm845_vm13, %v2644_v49, %v1083_v38  ;;  %v1659_v34 = vsel %vm846_vm10, %v2646_v41, %v1084_v37  ;;  %vm3245_vm0 = vmmov %vm3244_vm15 }
 0x405   : > { %1095 = vst [vmem:[#allocation2 + $0x10] sm:$0xf] %v1093_v12  ;;  %1096 = vst [vmem:[#allocation2 + $0x18] sm:$0xf] %v1094_v21  ;;  %v2746_v11 = vsel %vm3242_vm9, %v1090_v63, %v1658_v33  ;;  %v2750_v35 = vsel %vm3243_vm14, %v1089_v16, %v1659_v34  ;;  %1162 = vrot.lane.b32.xlu0 %v2690_v48, %s1999_s24  ;;  %1164 = vrot.lane.b32.xlu1 %v2694_v28, %s1999_s24  ;;  %vm3246_vm9 = vcmp.lt.s32.totalorder %v2076_v3, 126 }
 0x406   : > { %v1012_v56 = vsel %vm3245_vm0, %v1010_v31, %v1008_v25  ;;  %v1005_v39 = vsel %vm3246_vm9, %v1002_v59, %v1004_v14  ;;  %vm3247_vm14 = vmmov %vm3246_vm9  ;;  %vm3249_vm15 = vcmp.eq.s32.totalorder %v2082_v8, 1  ;;  %vm3251_vm0 = vcmp.eq.s32.totalorder %v2082_v8, 14  ;;  %v1185_v8 = vpop.permute.xlu0 %1184 }
 0x407   : > { %v1006_v40 = vsel %vm3247_vm14, %v1004_v14, %v1002_v59  ;;  %v1013_v17 = vsel %vm3248_vm1, %v2644_v49, %v1012_v56  ;;  %v1014_v57 = vsel %vm3249_vm15, %v2646_v41, %v1011_v36  ;;  %vm3250_vm1 = vcmp.eq.s32.totalorder %v2080_v7, 14  ;;  %v1187_v7 = vpop.permute.xlu1 %1186 }
 0x408   : > { %v2784_v18 = vsel %vm179_vm2, %v1005_v39, %v1013_v17  ;;  %v2788_v2 = vsel %vm180_vm3, %v1006_v40, %v1014_v57  ;;  %v1033_v43 = vsel %vm3250_vm1, %v2644_v49, %v1005_v39  ;;  %v1034_v44 = vsel %vm3251_vm0, %v2646_v41, %v1006_v40 }
 0x409   : > { %1168 = vrot.lane.b32.xlu0 %v2690_v48, %s2000_s25  ;;  %1170 = vrot.lane.b32.xlu1 %v2694_v28, %s2000_s25  ;;  %v2806_v45 = vsel %vm220_vm4, %v1012_v56, %v1033_v43  ;;  %v2810_v46 = vsel %vm221_vm5, %v1011_v36, %v1034_v44  ;;  %vm3252_vm2 = vcmp.eq.s32.totalorder %v2114_v19, 0  ;;  %vm3253_vm3 = vcmp.eq.s32.totalorder %v2117_v22, 15 }
 0x40a   : > { %v1191_v10 = vpop.permute.xlu0 %1190  ;;  %vm3254_vm4 = vcmp.eq.s32.totalorder %v2114_v19, 15  ;;  %vm3255_vm5 = vmmov %vm3252_vm2  ;;  %vm3256_vm9 = vcmp.lt.s32.totalorder %v2076_v3, 16  ;;  %vm3258_vm15 = vcmp.lt.s32.totalorder %v2076_v3, 112 }
 0x40b   : > { %v1193_v4 = vpop.permute.xlu1 %1192  ;;  %vm3257_vm14 = vmmov %vm3256_vm9  ;;  %v2908_v17 = vsel %vm3258_vm15, %v1185_v8, %v1187_v7 }
 0x40c   : > { %v2900_v39 = vsel %vm3256_vm9, %v1191_v10, %v1193_v4  ;;  %v2904_v40 = vsel %vm3257_vm14, %v1193_v4, %v1191_v10  ;;  %vm3259_vm1 = vmmov %vm3258_vm15 }
 0x40d   : > { %1200 = vrot.lane.b32.xlu0 %v2702_v26, %s1999_s24  ;;  %1202 = vrot.lane.b32.xlu1 %v2706_v13, %s1999_s24  ;;  %v2912_v57 = vsel %vm3259_vm1, %v1187_v7, %v1185_v8  ;;  %v1196_v43 = vsel %vm230_vm12, %v2908_v17, %v2904_v40  ;;  %vm3260_vm0 = vmmov %vm3252_vm2 }
 0x40e   : > { %v1197_v44 = vsel %vm3260_vm0, %v2912_v57, %v2900_v39 }
 0x411   : > { %1206 = vrot.lane.b32.xlu0 %v2702_v26, %s2000_s25  ;;  %1208 = vrot.lane.b32.xlu1 %v2706_v13, %s2000_s25 }
 0x415   : > { %1045 = vrot.lane.b32.xlu1 %v2788_v2, %s1997_s22  ;;  %1043 = vrot.lane.b32.xlu0 %v2784_v18, %s1997_s22 }
 0x419   : > { %1039 = vrot.lane.b32.xlu1 %v2788_v2, %s1998_s23  ;;  %1037 = vrot.lane.b32.xlu0 %v2784_v18, %s1998_s23 }
 0x41d   : > { %1129 = vrot.lane.b32.xlu1 %v2810_v46, %s1997_s22  ;;  %1127 = vrot.lane.b32.xlu0 %v2806_v45, %s1997_s22 }
 0x421   : > { %1123 = vrot.lane.b32.xlu1 %v2810_v46, %s1998_s23  ;;  %1121 = vrot.lane.b32.xlu0 %v2806_v45, %s1998_s23 }
 0x425   : > { %1148 = vrot.lane.b32.xlu1 %v2788_v2, %s1999_s24  ;;  %1146 = vrot.lane.b32.xlu0 %v2784_v18, %s1999_s24 }
 0x429   : > { %1154 = vrot.lane.b32.xlu1 %v2788_v2, %s2000_s25  ;;  %1152 = vrot.lane.b32.xlu0 %v2784_v18, %s2000_s25 }
 0x42d   : > { %1224 = vrot.lane.b32.xlu1 %v2810_v46, %s1999_s24  ;;  %1222 = vrot.lane.b32.xlu0 %v2806_v45, %s1999_s24  ;;  %s170_s24 = scalar_lea.vmem %s3207_s3, %s1905_s14 }
 0x431   : > { %1230 = vrot.lane.b32.xlu1 %v2810_v46, %s2000_s25  ;;  %1228 = vrot.lane.b32.xlu0 %v2806_v45, %s2000_s25 }
 0x467   : > { %v1064_v9 = vpop.permute.xlu1 %1063  ;;  %v1062_v5 = vpop.permute.xlu0 %1061 }
 0x468   : > { %v1065_v50 = vsel %vm245_vm6, %v1062_v5, %v1064_v9  ;;  %v1066_v15 = vsel %vm245_vm6, %v1064_v9, %v1062_v5 }
 0x469   : > { %v1067_v30 = vsel %vm239_vm8, %v2690_v48, %v1066_v15  ;;  %v1068_v29 = vsel %vm240_vm7, %v2694_v28, %v1065_v50 }
 0x46b   : > { %v1106_v6 = vpop.permute.xlu1 %1105  ;;  %v1104_v42 = vpop.permute.xlu0 %1103 }
 0x46c   : > { %v2848_v54 = vsel %vm245_vm6, %v1104_v42, %v1106_v6  ;;  %v2852_v55 = vsel %vm245_vm6, %v1106_v6, %v1104_v42 }
 0x46d   : > { %v1109_v51 = vsel %vm239_vm8, %v2702_v26, %v2852_v55  ;;  %v1110_v20 = vsel %vm240_vm7, %v2706_v13, %v2848_v54 }
 0x46f   : > { %v1058_v23 = vpop.permute.xlu1 %1057  ;;  %v1056_v24 = vpop.permute.xlu0 %1055 }
 0x470   : > { %v1059_v61 = vsel %vm236_vm11, %v1056_v24, %v1058_v23  ;;  %v1060_v47 = vsel %vm236_vm11, %v1058_v23, %v1056_v24 }
 0x471   : > { %v1069_v27 = vsel %vm230_vm12, %v1059_v61, %v1067_v30  ;;  %v1070_v62 = vsel %vm3252_vm2, %v1060_v47, %v1068_v29  ;;  %v1646_v31 = vsel %vm845_vm13, %v2690_v48, %v1059_v61  ;;  %v1647_v25 = vsel %vm846_vm10, %v2694_v28, %v1060_v47  ;;  %vm3261_vm2 = vmmov %vm3259_vm1 }
 0x472   : > { %v1073_v14 = vrot.slane %v1069_v27, 4  ;;  %v1074_v59 = vrot.slane %v1070_v62, 4  ;;  %v2870_v32 = vsel %vm3253_vm3, %v1066_v15, %v1646_v31  ;;  %v2874_v58 = vsel %vm3254_vm4, %v1065_v50, %v1647_v25  ;;  %vm3262_vm3 = vmmov %vm3259_vm1 }
 0x473   : > { %v1100_v16 = vpop.permute.xlu1 %1099  ;;  %v1098_v63 = vpop.permute.xlu0 %1097  ;;  %vm3263_vm4 = vmmov %vm3256_vm9 }
 0x474   : > { %1077 = vst [vmem:[#allocation2] sm:$0xf0] %v1073_v14  ;;  %1078 = vst [vmem:[#allocation2 + $0x8] sm:$0xf0] %v1074_v59  ;;  %v2886_v52 = vsel %vm236_vm11, %v1098_v63, %v1100_v16  ;;  %v2890_v60 = vsel %vm236_vm11, %v1100_v16, %v1098_v63 }
 0x475   : > { %v1111_v38 = vsel %vm230_vm12, %v2886_v52, %v1109_v51  ;;  %v1112_v37 = vsel %vm3255_vm5, %v2890_v60, %v1110_v20  ;;  %vm3264_vm5 = vmmov %vm3263_vm4 }
 0x476   : > { %v1115_v12 = vrot.slane %v1111_v38, 4  ;;  %v1116_v21 = vrot.slane %v1112_v37, 4  ;;  %vm3265_vm9 = vmmov %vm3260_vm0 }
 0x477   : > { %v1165_v33 = vpop.permute.xlu1 %1164  ;;  %v1163_v34 = vpop.permute.xlu0 %1162  ;;  %vm3266_vm14 = vmmov %vm3263_vm4 }
 0x478   : > { %1119 = vst [vmem:[#allocation2 + $0x10] sm:$0xf0] %v1115_v12  ;;  %1120 = vst [vmem:[#allocation2 + $0x18] sm:$0xf0] %v1116_v21  ;;  %v1420_v12 = vrot.slane %v2702_v26, 4  ;;  %v1421_v21 = vrot.slane %v2706_v13, 4 }
 0x479   : > { %vm3267_vm15 = vmmov %vm3263_vm4 }
 0x47a   : > { %vm3268_vm1 = vmmov %vm3260_vm0 }
 0x47b   : > { %v1171_v36 = vpop.permute.xlu1 %1170  ;;  %v1169_v56 = vpop.permute.xlu0 %1168  ;;  %vm3269_vm0 = vmmov %vm3261_vm2 }
 0x47c   : > { %v2964_v51 = vsel %vm3266_vm14, %v1169_v56, %v1171_v36  ;;  %v2968_v20 = vsel %vm3267_vm15, %v1171_v36, %v1169_v56  ;;  %vm3279_vm14 = vmmov %vm3269_vm0 }
 0x47d   : > { %vm3280_vm15 = vmmov %vm3269_vm0 }
 0x47f   : > { %v1203_v4 = vpop.permute.xlu1 %1202  ;;  %v1201_v10 = vpop.permute.xlu0 %1200  ;;  %v2922_v9 = vld [vmem:[#allocation2 + $0x10] sm:$0xff]  ;;  %v2924_v5 = vld [vmem:[#allocation2 + $0x18] sm:$0xff] }
 0x480   : > { %1198 = vst [vmem:[#allocation2 + $0x10] sm:$0xf] %v1196_v43  ;;  %1199 = vst [vmem:[#allocation2 + $0x18] sm:$0xf] %v1197_v44  ;;  %v1204_v6 = vsel %vm3261_vm2, %v1201_v10, %v1203_v4  ;;  %v1205_v42 = vsel %vm3262_vm3, %v1203_v4, %v1201_v10  ;;  %v2980_v43 = vsel %vm3269_vm0, %v1163_v34, %v1165_v33 }
 0x481   : > { %vm3270_vm2 = vmmov %vm3269_vm0 }
 0x482   : > { %v2984_v36 = vsel %vm3270_vm2, %v1165_v33, %v1163_v34  ;;  %vm3271_vm3 = vmmov %vm3268_vm1 }
 0x483   : > { %v1209_v7 = vpop.permute.xlu1 %1208  ;;  %v1207_v8 = vpop.permute.xlu0 %1206  ;;  %vm3283_vm2 = vmmov %vm3271_vm3 }
 0x484   : > { %v1210_v50 = vsel %vm3263_vm4, %v1207_v8, %v1209_v7  ;;  %v1211_v15 = vsel %vm3264_vm5, %v1209_v7, %v1207_v8  ;;  %v1174_v7 = vsel %vm230_vm12, %v2980_v43, %v2968_v20  ;;  %v1175_v8 = vsel %vm3271_vm3, %v2984_v36, %v2964_v51  ;;  %vm3284_vm3 = vmmov %vm3279_vm14 }
 0x485   : > { %v1212_v30 = vsel %vm230_vm12, %v1204_v6, %v1211_v15  ;;  %v1213_v29 = vsel %vm3265_vm9, %v1205_v42, %v1210_v50  ;;  %vm3272_vm4 = vcmp.eq.s32.totalorder %v2117_v22, 15  ;;  %vm3273_vm5 = vcmp.eq.s32.totalorder %v2114_v19, 15 }
 0x486   : > { %v1216_v23 = vrot.slane %v1212_v30, 4  ;;  %v1217_v24 = vrot.slane %v1213_v29, 4  ;;  %v1178_v30 = vrot.slane %v1174_v7, 4  ;;  %v1179_v29 = vrot.slane %v1175_v8, 4  ;;  %vm3278_vm9 = vmmov %vm3273_vm5 }
 0x487   : > { %v1046_v61 = vpop.permute.xlu1 %1045  ;;  %v1044_v47 = vpop.permute.xlu0 %1043  ;;  %v1664_v7 = vsel %vm845_vm13, %v2702_v26, %v2886_v52 }
 0x488   : > { %1220 = vst [vmem:[#allocation2 + $0x10] sm:$0xf0] %v1216_v23  ;;  %1221 = vst [vmem:[#allocation2 + $0x18] sm:$0xf0] %v1217_v24  ;;  %v2940_v27 = vsel %vm245_vm6, %v1044_v47, %v1046_v61  ;;  %v2944_v62 = vsel %vm245_vm6, %v1046_v61, %v1044_v47  ;;  %v1536_v23 = vsel %vm3272_vm4, %v1211_v15, %v1204_v6 }
 0x489   : > { %v1049_v14 = vsel %vm239_vm8, %v2784_v18, %v2944_v62  ;;  %v1050_v59 = vsel %vm240_vm7, %v2788_v2, %v2940_v27 }
 0x48b   : > { %v1040_v31 = vpop.permute.xlu1 %1039  ;;  %v1038_v25 = vpop.permute.xlu0 %1037 }
 0x48c   : > { %v2956_v16 = vsel %vm236_vm11, %v1038_v25, %v1040_v31  ;;  %v2960_v63 = vsel %vm236_vm11, %v1040_v31, %v1038_v25 }
 0x48d   : > { %v1051_v38 = vsel %vm230_vm12, %v2956_v16, %v1049_v14  ;;  %v1052_v37 = vsel %vm3268_vm1, %v2960_v63, %v1050_v59  ;;  %v1540_v14 = vrot.slane %v1536_v23, 4 }
 0x48e   : > { %1053 = vst [vmem:[#allocation2] sm:$0xf] %v1051_v38  ;;  %1054 = vst [vmem:[#allocation2 + $0x8] sm:$0xf] %v1052_v37 }
 0x48f   : > { %v1130_v56 = vpop.permute.xlu1 %1129  ;;  %v1128_v44 = vpop.permute.xlu0 %1127  ;;  %v2986_v4 = vld [vmem:[#allocation2 + $0x18] sm:$0xff]  ;;  %v2988_v10 = vld [vmem:[#allocation2 + $0x10] sm:$0xff] }
 0x490   : > { %1417 = vst [vmem:[#allocation2 + $0x18] sm:$0xf] %v2646_v41  ;;  %1425 = vst [vmem:[#allocation2 + $0x18] sm:$0xf0] %v1421_v21  ;;  %v3002_v33 = vsel %vm245_vm6, %v1128_v44, %v1130_v56  ;;  %v3006_v34 = vsel %vm245_vm6, %v1130_v56, %v1128_v44  ;;  %v1537_v41 = vsel %vm3273_vm5, %v1210_v50, %v1205_v42 }
 0x491   : > { %1416 = vst [vmem:[#allocation2 + $0x10] sm:$0xf] %v2644_v49  ;;  %1424 = vst [vmem:[#allocation2 + $0x10] sm:$0xf0] %v1420_v12  ;;  %v1133_v49 = vsel %vm239_vm8, %v2806_v45, %v3006_v34  ;;  %v1134_v47 = vsel %vm240_vm7, %v2810_v46, %v3002_v33  ;;  %v1541_v59 = vrot.slane %v1537_v41, 4 }
 0x492   : > { %vm3274_vm6 = vmmov %vm3268_vm1  ;;  %vm3281_vm1 = vcmp.lt.s32.totalorder %v2076_v3, 16 }
 0x493   : > { %v1124_v24 = vpop.permute.xlu1 %1123  ;;  %v1122_v61 = vpop.permute.xlu0 %1121  ;;  %vm3275_vm7 = vmmov %vm3272_vm4 }
 0x494   : > { %v3022_v31 = vsel %vm236_vm11, %v1122_v61, %v1124_v24  ;;  %v3026_v6 = vsel %vm236_vm11, %v1124_v24, %v1122_v61  ;;  %v1532_v38 = vsel %vm3275_vm7, %v2904_v40, %v2908_v17  ;;  %vm3276_vm8 = vmmov %vm3273_vm5  ;;  %v1665_v40 = vsel %vm846_vm10, %v2706_v13, %v2890_v60 }
 0x495   : > { %v1135_v42 = vsel %vm230_vm12, %v3022_v31, %v1133_v49  ;;  %v1136_v50 = vsel %vm3274_vm6, %v3026_v6, %v1134_v47  ;;  %v3034_v15 = vld [vmem:[#allocation2] sm:$0xff]  ;;  %v3036_v25 = vld [vmem:[#allocation2 + $0x8] sm:$0xff]  ;;  %v1533_v37 = vsel %vm3276_vm8, %v2900_v39, %v2912_v57  ;;  %vm3277_vm11 = vmmov %vm3272_vm4  ;;  %v1667_v17 = vsel %vm3278_vm9, %v2848_v54, %v1665_v40 }
 0x496   : > { %1137 = vst [vmem:[#allocation2 + $0x20] sm:$0xf] %v1135_v42  ;;  %1138 = vst [vmem:[#allocation2 + $0x28] sm:$0xf] %v1136_v50  ;;  %v1666_v39 = vsel %vm3277_vm11, %v2852_v55, %v1664_v7  ;;  %v1410_v49 = vrot.slane %v2690_v48, 4  ;;  %v1411_v47 = vrot.slane %v2694_v28, 4 }
 0x497   : > { %1182 = vst [vmem:[#allocation2] sm:$0xf0] %v1178_v30  ;;  %1183 = vst [vmem:[#allocation2 + $0x8] sm:$0xf0] %v1179_v29  ;;  %v1149_v12 = vpop.permute.xlu1 %1148  ;;  %v1147_v21 = vpop.permute.xlu0 %1146  ;;  %v3046_v56 = vld [vmem:[#allocation2 + $0x18] sm:$0xff]  ;;  %v1670_v30 = vrot.slane %v1666_v39, 4 }
 0x498   : > { %v3048_v44 = vld [vmem:[#allocation2 + $0x10] sm:$0xff]  ;;  %1535 = vst [vmem:[#allocation2 + $0x18] sm:$0xf] %v1533_v37  ;;  %1545 = vst [vmem:[#allocation2 + $0x18] sm:$0xf0] %v1541_v59  ;;  %v1150_v26 = vsel %vm3279_vm14, %v1147_v21, %v1149_v12  ;;  %v1151_v13 = vsel %vm3280_vm15, %v1149_v12, %v1147_v21  ;;  %v1671_v29 = vrot.slane %v1667_v17, 4 }
 0x499   : > { %1534 = vst [vmem:[#allocation2 + $0x10] sm:$0xf] %v1532_v38  ;;  %1544 = vst [vmem:[#allocation2 + $0x10] sm:$0xf0] %v1540_v14  ;;  %vm3293_vm14 = vcmask 1043456  }
 0x49a   : > { %vm3282_vm0 = vmmov %vm3281_vm1 }
 0x49b   : > { %v1155_v57 = vpop.permute.xlu1 %1154  ;;  %v1153_v8 = vpop.permute.xlu0 %1152  ;;  %vm3285_vm4 = vmmov %vm3284_vm3 }
 0x49c   : > { %v1156_v52 = vsel %vm3281_vm1, %v1153_v8, %v1155_v57  ;;  %v1157_v60 = vsel %vm3282_vm0, %v1155_v57, %v1153_v8  ;;  %vm3286_vm5 = vmmov %vm3282_vm0  ;;  %vm3295_vm1 = vcmask 162816  }
 0x49d   : > { %v1158_v55 = vsel %vm230_vm12, %v1150_v26, %v1157_v60  ;;  %v1159_v54 = vsel %vm3283_vm2, %v1151_v13, %v1156_v52  ;;  %v1144_v38 = vld [vmem:[#allocation2 + $0x20] sm:$0xf]  ;;  %vm3287_vm6 = vmmov %vm3282_vm0  ;;  %v1145_v37 = vld [vmem:[#allocation2 + $0x28] sm:$0xf] }
 0x49e   : > { %1160 = vst [vmem:[#allocation2] sm:$0xf] %v1158_v55  ;;  %1161 = vst [vmem:[#allocation2 + $0x8] sm:$0xf] %v1159_v54 }
 0x49f   : > { %v1225_v23 = vpop.permute.xlu1 %1224  ;;  %v1223_v41 = vpop.permute.xlu0 %1222  ;;  %v3076_v24 = vld [vmem:[#allocation2 + $0x18] sm:$0xff]  ;;  %vm3288_vm7 = vmmov %vm3283_vm2 }
 0x4a0   : > { %v3078_v61 = vld [vmem:[#allocation2 + $0x10] sm:$0xff]  ;;  %1663 = vst [vmem:[#allocation2 + $0x18] sm:$0xf] %v2750_v35  ;;  %1675 = vst [vmem:[#allocation2 + $0x18] sm:$0xf0] %v1671_v29  ;;  %v1226_v14 = vsel %vm3284_vm3, %v1223_v41, %v1225_v23  ;;  %v1227_v59 = vsel %vm3285_vm4, %v1225_v23, %v1223_v41 }
 0x4a1   : > { %1662 = vst [vmem:[#allocation2 + $0x10] sm:$0xf] %v2746_v11  ;;  %1674 = vst [vmem:[#allocation2 + $0x10] sm:$0xf0] %v1670_v30  ;;  %v1895_v23 = vld [vmem:[%s3206_s2 + $0xc] sm:$0xf] }
 0x4a2   : > { %vm3294_vm15 = vmmov %vm3293_vm14 }
 0x4a3   : > { %v1231_v42 = vpop.permute.xlu1 %1230  ;;  %v1229_v50 = vpop.permute.xlu0 %1228  ;;  %vm3296_vm0 = vmmov %vm3293_vm14 }
 0x4a4   : > { %v1232_v35 = vsel %vm3286_vm5, %v1229_v50, %v1231_v42  ;;  %v1233_v11 = vsel %vm3287_vm6, %v1231_v42, %v1229_v50  ;;  %vm3300_vm5 = vmmov %vm3296_vm0 }
 0x4a5   : > { %v1234_v48 = vsel %vm230_vm12, %v1226_v14, %v1233_v11  ;;  %v1235_v28 = vsel %vm3288_vm7, %v1227_v59, %v1232_v35  ;;  %v1241_v12 = vld [vmem:[#allocation2 + $0x8] sm:$0xff]  ;;  %v1240_v21 = vld [vmem:[#allocation2] sm:$0xff]  ;;  %vm3289_vm12 = vmmov %vm3276_vm8 }
 0x4a6   : > { %1236 = vst [vmem:[#allocation2 + $0x20] sm:$0xf] %v1234_v48  ;;  %1237 = vst [vmem:[#allocation2 + $0x28] sm:$0xf] %v1235_v28  ;;  %v1927_v7 = vpack.c.bf16 %v2986_v4, %v1241_v12  ;;  %v1929_v40 = vpack.c.bf16 %v2988_v10, %v1240_v21  ;;  %v1523_v3 = vsel %vm3289_vm12, %v2964_v51, %v2984_v36  ;;  %v1884_v10 = vld [vmem:[%s3206_s2 + $0x4] sm:$0xf] }
 0x4a7   : > { %1407 = vst [vmem:[#allocation2 + $0x8] sm:$0xf] %v2788_v2  ;;  %1415 = vst [vmem:[#allocation2 + $0x8] sm:$0xf0] %v1411_v47  ;;  %v1527_v39 = vrot.slane %v1523_v3, 4  ;;  %v1933_v36 = vpack.c.bf16 %v2922_v9, %v3034_v15  ;;  %v1640_v9 = vsel %vm845_vm13, %v2784_v18, %v2956_v16  ;;  %v1653_v15 = vrot.slane %v2874_v58, 4 }
 0x4a8   : > { %1406 = vst [vmem:[#allocation2] sm:$0xf] %v2784_v18  ;;  %1414 = vst [vmem:[#allocation2] sm:$0xf0] %v1410_v49  ;;  %1928 = vmatprep.subr.bf16.mxu1 %v1927_v7  ;;  %v1687_v19 = vld [vmem:[#allocation2 + $0x18] sm:$0xff]  ;;  %v1686_v41 = vld [vmem:[#allocation2 + $0x10] sm:$0xff] }
 0x4a9   : > { %1930 = vmatpush1.bf16.msra.mxu1 %v1929_v40  ;;  %vm3290_vm8 = vmmov %vm3277_vm11  ;;  %v1899_v47 = vld [vmem:[%s3206_s2 + $0x10] sm:$0xf] }
 0x4aa   : > { %v1522_v4 = vsel %vm3290_vm8, %v2968_v20, %v2980_v43  ;;  %vm3291_vm11 = vmmov %vm3278_vm9  ;;  %v1931_v20 = vpack.c.bf16 %v2924_v5, %v3036_v25  ;;  %v1641_v5 = vsel %vm846_vm10, %v2788_v2, %v2960_v63 }
 0x4ab   : > { %v1526_v17 = vrot.slane %v1522_v4, 4  ;;  %v1519_v57 = vsel %vm3291_vm11, %v1156_v52, %v1151_v13  ;;  %vm3292_vm9 = vmmov %vm3290_vm8  ;;  %v1652_v13 = vrot.slane %v2870_v32, 4 }
 0x4ac   : > { %v1518_v51 = vsel %vm3292_vm9, %v1157_v60, %v1150_v26  ;;  %v1139_v26 = vld [vmem:[%s3206_s2] sm:$0xf]  ;;  %vm3297_vm2 = vmmov %vm3291_vm11  ;;  %v1677_v60 = vsel %vm846_vm10, %v2810_v46, %v3026_v6 }
 0x4ad   : > { %v1245_v8 = vld [vmem:[#allocation2 + $0x28] sm:$0xf]  ;;  %v1244_v55 = vld [vmem:[#allocation2 + $0x20] sm:$0xf]  ;;  %v1643_v2 = vsel %vm3297_vm2, %v2940_v27, %v1641_v5  ;;  %vm3298_vm3 = vmmov %vm3290_vm8 }
 0x4ae   : > { %v1431_v54 = vld [vmem:[#allocation2 + $0x8] sm:$0xff]  ;;  %1885 = vmatprep.subr.msk.mxu1 %vm3293_vm14, %v1245_v8  ;;  %1427 = vst [vmem:[#allocation2 + $0x28] sm:$0xf] %v2810_v46  ;;  %1426 = vst [vmem:[#allocation2 + $0x20] sm:$0xf] %v2806_v45  ;;  %v1546_v63 = vsel %vm3298_vm3, %v1233_v11, %v1226_v14 }
 0x4af   : > { %1521 = vst [vmem:[#allocation2 + $0x8] sm:$0xf] %v1519_v57  ;;  %1531 = vst [vmem:[#allocation2 + $0x8] sm:$0xf0] %v1527_v39  ;;  %v1430_v43 = vld [vmem:[#allocation2] sm:$0xff]  ;;  %1886 = vmatpush1.msk.msra.mxu1 %vm3294_vm15, %v1244_v55  ;;  %v1935_v25 = vpack.c.bf16 %v3046_v56, %v1431_v54 }
 0x4b0   : > { %1520 = vst [vmem:[#allocation2] sm:$0xf] %v1518_v51  ;;  %1530 = vst [vmem:[#allocation2] sm:$0xf0] %v1526_v17  ;;  %1887 = vmatmul.mubr.msk.f32.vlgmr.msra.gmra.mrb[0].mxu1 %vm3295_vm1, %v1884_v10  ;;  %1932 = vmatprep.subr.bf16.mxu1 %v1931_v20  ;;  %v1937_v27 = vpack.c.bf16 %v3048_v44, %v1430_v43 }
 0x4b1   : > { %1934 = vmatpush1.bf16.msra.mxu1 %v1933_v36  ;;  %1399 = vmatprep.mubr.f32.mxu1 %v2001_v53  ;;  %vm3299_vm4 = vmmov %vm3297_vm2 }
 0x4b2   : > { %1888 = vmatprep.subr.msk.mxu1 %vm3296_vm0, %v1145_v37  ;;  %v1547_v18 = vsel %vm3299_vm4, %v1232_v35, %v1227_v59  ;;  %vm3301_vm6 = vmmov %vm3298_vm3 }
 0x4b3   : > { %v1642_v52 = vsel %vm3301_vm6, %v2944_v62, %v1640_v9  ;;  %vm3302_vm7 = vmmov %vm3295_vm1  ;;  %v1676_v62 = vsel %vm845_vm13, %v2806_v45, %v3022_v31  ;;  %v1891_v45 = vld [vmem:[%s3206_s2 + $0x8] sm:$0xf] }
 0x4b4   : > { %vm3303_vm12 = vmmov %vm3296_vm0 }
 0x4b5   : > { %1889 = vmatpush1.msk.msra.mxu1 %vm3300_vm5, %v1144_v38  ;;  %v1435_v58 = vld [vmem:[#allocation2 + $0x28] sm:$0xf]  ;;  %v1434_v16 = vld [vmem:[#allocation2 + $0x20] sm:$0xf]  ;;  %vm3304_vm8 = vmmov %vm3298_vm3 }
 0x4b6   : > { %v1553_v56 = vld [vmem:[#allocation2 + $0x8] sm:$0xff]  ;;  %1936 = vmatprep.subr.bf16.mxu1 %v1935_v25  ;;  %1549 = vst [vmem:[#allocation2 + $0x28] sm:$0xf] %v1547_v18  ;;  %1548 = vst [vmem:[#allocation2 + $0x20] sm:$0xf] %v1546_v63  ;;  %v1678_v30 = vsel %vm3304_vm8, %v3006_v34, %v1676_v62 }
 0x4b7   : > { %1645 = vst [vmem:[#allocation2 + $0x8] sm:$0xf] %v1643_v2  ;;  %1657 = vst [vmem:[#allocation2 + $0x8] sm:$0xf0] %v1653_v15  ;;  %v1552_v32 = vld [vmem:[#allocation2] sm:$0xff]  ;;  %v1939_v44 = vpack.c.bf16 %v3076_v24, %v1553_v56 }
 0x4b8   : > { %1644 = vst [vmem:[#allocation2] sm:$0xf] %v1642_v52  ;;  %1656 = vst [vmem:[#allocation2] sm:$0xf0] %v1652_v13  ;;  %1890 = vmatmul.mubr.msk.f32.vlgmr.msra.gmra.mrb[0].mxu1 %vm3302_vm7, %v1139_v26  ;;  %v1941_v6 = vpack.c.bf16 %v3078_v61, %v1552_v32 }
 0x4b9   : > { %1938 = vmatpush1.bf16.msra.mxu1 %v1937_v27  ;;  %1509 = vmatprep.mubr.f32.mxu1 %v2001_v53  ;;  %vm3305_vm11 = vmmov %vm3297_vm2 }
 0x4ba   : > { %1892 = vmatprep.subr.msk.mxu1 %vm3303_vm12, %v1435_v58  ;;  %v1679_v29 = vsel %vm3305_vm11, %v3002_v33, %v1677_v60  ;;  %vm3306_vm9 = vmmov %vm3296_vm0 }
 0x4bb   : > { %vm3307_vm10 = vmmov %vm3295_vm1 }
 0x4bc   : > { %vm3308_vm13 = vmmov %vm3296_vm0 }
 0x4bd   : > { %1893 = vmatpush1.msk.msra.mxu1 %vm3306_vm9, %v1434_v16  ;;  %v1557_v31 = vld [vmem:[#allocation2 + $0x28] sm:$0xf]  ;;  %v1556_v46 = vld [vmem:[#allocation2 + $0x20] sm:$0xf]  ;;  %vm3309_vm14 = vmmov %vm3296_vm0 }
 0x4be   : > { %1940 = vmatprep.subr.bf16.mxu1 %v1939_v44  ;;  %1681 = vst [vmem:[#allocation2 + $0x28] sm:$0xf] %v1679_v29  ;;  %1680 = vst [vmem:[#allocation2 + $0x20] sm:$0xf] %v1678_v30  ;;  %v1685_v22 = vld [vmem:[#allocation2 + $0x8] sm:$0xff] }
 0x4bf   : > { %v1943_v33 = vpack.c.bf16 %v1687_v19, %v1685_v22  ;;  %v1684_v34 = vld [vmem:[#allocation2] sm:$0xff]  ;;  %vm3310_vm15 = vmmov %vm3295_vm1 }
 0x4c0   : > { %1894 = vmatmul.mubr.msk.f32.vlgmr.msra.gmra.mrb[0].mxu1 %vm3307_vm10, %v1891_v45  ;;  %v1945_v24 = vpack.c.bf16 %v1686_v41, %v1684_v34  ;;  %vm3311_vm1 = vmmov %vm3296_vm0 }
 0x4c1   : > { %1942 = vmatpush1.bf16.msra.mxu1 %v1941_v6  ;;  %1631 = vmatprep.mubr.f32.mxu1 %v2001_v53  ;;  %vm3312_vm2 = vmmov %vm3302_vm7 }
 0x4c2   : > { %1896 = vmatprep.subr.msk.mxu1 %vm3308_vm13, %v1557_v31  ;;  %vm3313_vm3 = vmmov %vm3296_vm0 }
 0x4c3   : > { %vm3314_vm4 = vmmov %vm3296_vm0 }
 0x4c4   : > { %vm3315_vm5 = vmmov %vm3296_vm0 }
 0x4c5   : > { %1897 = vmatpush1.msk.msra.mxu1 %vm3309_vm14, %v1556_v46  ;;  %v1689_v61 = vld [vmem:[#allocation2 + $0x28] sm:$0xf]  ;;  %v1688_v49 = vld [vmem:[#allocation2 + $0x20] sm:$0xf]  ;;  %vm3316_vm6 = vmmov %vm3296_vm0 }
 0x4c6   : > { %1944 = vmatprep.subr.bf16.mxu1 %v1943_v33 }
 0x4c8   : > { %1898 = vmatmul.mubr.msk.f32.vlgmr.msra.gmra.mrb[0].mxu1 %vm3310_vm15, %v1895_v23 }
 0x4c9   : > { %1946 = vmatpush1.bf16.msra.mxu1 %v1945_v24  ;;  %1763 = vmatprep.mubr.f32.mxu1 %v2001_v53 }
 0x4ca   : > { %1900 = vmatprep.subr.msk.mxu1 %vm3311_vm1, %v1689_v61 }
 0x4cd   : > { %1901 = vmatpush1.msk.msra.mxu1 %vm3296_vm0, %v1688_v49 }
 0x4d0   : > { %1902 = vmatmul.mubr.msk.f32.vlgmr.msra.gmra.mrb[0].mxu1 %vm3312_vm2, %v1899_v47 }
 0x5a3   : > { %v1765_v42 = vpop.f32.mrb[0].mxu1 }
 0x5a4   : > { %v1772_v50 = vsel %vm3313_vm3, %v1765_v42, 0.0  ;;  %v1767_v14 = vpop.f32.mrb[1].mxu1 }
 0x5a5   : > { %v1773_v59 = vsel %vm3314_vm4, %v1767_v14, 0.0 }
 0x5a6   : > { %v1774_v38 = vadd.f32 %v1773_v59, %v1772_v50 }
 0x5a8   : > { %1775 = vadd.xlane.f32.xlu0 %v1774_v38 }
 0x635   : > { %v1776_v53 = vpop.xlane.xlu0 %1775 }
 0x636   : > { %v1777_v35 = vmul.f32 0.00390625, %v1776_v53 }
 0x638   : > { %v1778_v11 = vsub.f32 %v1765_v42, %v1777_v35  ;;  %v1779_v37 = vsub.f32 %v1767_v14, %v1777_v35 }
 0x63a   : > { %v1780_v48 = vmul.f32 %v1778_v11, %v1778_v11  ;;  %v1781_v28 = vmul.f32 %v1779_v37, %v1779_v37 }
 0x63c   : > { %v1782_v12 = vsel %vm3315_vm5, %v1780_v48, 0.0  ;;  %v1783_v21 = vsel %vm3316_vm6, %v1781_v28, 0.0 }
 0x63d   : > { %v1784_v7 = vadd.f32 %v1783_v21, %v1782_v12 }
 0x63f   : > { %1785 = vadd.xlane.f32.xlu1 %v1784_v7 }
 0x6cc   : > { %v1786_v40 = vpop.xlane.xlu1 %1785 }
 0x6cd   : > { %v1787_v3 = vmul.f32 0.00390625, %v1786_v40 }
 0x6cf   : > { %v1788_v4 = vadd.f32 1e-05, %v1787_v3 }
 0x6d1   : > { %1983 = vrsqrt.f32 %v1788_v4 }
 0x6db   : > { %v1984_v39 = vpop.eup %1983 }
 0x6dc   : > { %v1790_v10 = vmul.f32 %v1984_v39, %v1778_v11  ;;  %v1791_v17 = vmul.f32 %v1984_v39, %v1779_v37 }
 0x6de   : > { %v1792_v57 = vmax.f32 %v1790_v10, 0.0  ;;  %v1793_v8 = vmax.f32 %v1791_v17, 0.0 }
 0x6e0   : > { %v1794_v55 = vadd.f32 %v1792_v57, %v2038_v0  ;;  %v1795_v54 = vadd.f32 %v1793_v8, %v2046_v1 }
 0x6e2   : > { %v1798_v51 = vcombine.low %v1794_v55, %v1795_v54 }
 0x6e4   : > { %1800 = vst [vmem:[%s170_s24] sm:$0xff] %v1798_v51 }
 0x6e5 PF: > { %s13_s12 = sadd.s32 1, %s1991_s12  }
 0x6e6   : > { %p10_p4 = scmp.ge.s32.totalorder %s13_s12, 4  }
 0x6e8   :  { %12 = sbr.rel (!%p10_p4) target bundleno = 1 (0x1), region = 70 }

</bundles_post_ra>
